<compile_context>
chip_gen: v6e
topology: v6e:2x2x1
jax: 0.10.0
libtpu: 0.0.40
codegen_flags: <defaults>
</compile_context>

<pallas_src>
import math
import functools

import jax
import jax.numpy as jnp
from jax import lax
from jax.experimental import pallas as pl
from jax.experimental.pallas import tpu as pltpu


# ----------------------------- kernel helpers -------------------------------

def _tnorm(x, alpha, bias, eps):
    """NormLayer: alpha * ((x - mean)/std + eps) + bias, torch-style unbiased std.

    Uses rsqrt (EUP slot) instead of sqrt + divide (VALU).  No epsilon inside
    the rsqrt: the reference divides by the raw std, so a constant row would
    be inf/NaN in the reference too (documented fidelity choice).
    """
    d = x.shape[-1]
    mean = jnp.mean(x, axis=-1, keepdims=True)
    cent = x - mean
    var = jnp.sum(cent * cent, axis=-1, keepdims=True) * (1.0 / (d - 1))
    return alpha * (cent * lax.rsqrt(var) + eps) + bias


def _softmax_last(x):
    x = x - jnp.max(x, axis=-1, keepdims=True)
    e = jnp.exp(x)
    # approx reciprocal -> EUP; not bit-exact vs f32 torch softmax (documented).
    return e * pl.reciprocal(jnp.sum(e, axis=-1, keepdims=True), approx=True)


# ----------------------------- Pallas kernel ---------------------------------

def encoder_stack_kernel(x_ref, mask_ref,
                         ln1a_ref, ln1b_ref,
                         wq_ref, bq_ref, wk_ref, bk_ref,
                         wo_ref, bo_ref,
                         ln2a_ref, ln2b_ref,
                         w1_ref, b1_ref, w2_ref, b2_ref,
                         fna_ref, fnb_ref,
                         o_ref,
                         x_scr, mask_scr,
                         *, heads, eps, bt, seq):
    l = pl.program_id(1)
    H = heads

    # ---- first layer step of each batch tile: fold (Bt,S,D) -> (Bt*S,D)
    # activation carry and hoist the layer-invariant additive attention mask
    # (already broadcast to (Bt*H, 1, S)) into VMEM scratch.
    @pl.when(l == 0)
    def _():
        x_scr[...] = x_ref[...].reshape(x_scr.shape)
        madd = jnp.where(mask_ref[...] == 0,
                         jnp.float32(-1e9), jnp.float32(0.0))      # (Bt,1,S)
        mask_scr[...] = jnp.broadcast_to(
            madd[:, None], (bt, H, 1, seq)).reshape(bt * H, 1, seq)

    x = x_scr[...]                                   # (M, D) f32, M = Bt*S
    M, D = x.shape
    dh = D // H
    inv_sqrt_dh = jnp.float32(1.0 / math.sqrt(dh))

    # ---- norm_1 ----
    xn_b = _tnorm(x, ln1a_ref[0], ln1b_ref[0], eps).astype(jnp.bfloat16)

    # ---- q/k projections: one (M,D)@(D,D) each (weights pre-transposed,
    # bf16 into the MXU, f32 accumulation) ----
    q = jnp.dot(xn_b, wq_ref[0], preferred_element_type=jnp.float32) + bq_ref[0]
    k = jnp.dot(xn_b, wk_ref[0], preferred_element_type=jnp.float32) + bk_ref[0]
    # Reference bug reproduced: v = k_linear(v) -> v is bit-identical to k,
    # so the third projection matmul is eliminated (v_linear exists, unused).

    # 1/sqrt(d_head) folded into q before QK^T (M*D mul instead of H*S*S).
    q = q * inv_sqrt_dh

    # ---- head split: one reshape + one leading-axis swap (replaces per-head
    # lane slicing / stack / concat) -> head-batched (Bt*H, S, dh) operands.
    def split_heads(t2d):
        t4 = t2d.reshape(bt, seq, H, dh)
        return jnp.swapaxes(t4, 1, 2).reshape(bt * H, seq, dh)

    qh = split_heads(q).astype(jnp.bfloat16)
    kh = split_heads(k).astype(jnp.bfloat16)         # also serves as V (v == k)

    scores = jnp.einsum('hqd,hkd->hqk', qh, kh,
                        preferred_element_type=jnp.float32)        # (Bt*H,S,S)
    probs = _softmax_last(scores + mask_scr[...])                  # f32 softmax
    ctx = jnp.einsum('hqk,hkd->hqd', probs.astype(jnp.bfloat16), kh,
                     preferred_element_type=jnp.float32)           # (Bt*H,S,dh)

    # ---- head merge: inverse swap + plain reshape back to (M, D) ----
    concat = jnp.swapaxes(ctx.reshape(bt, H, seq, dh), 1, 2).reshape(M, D)

    att = jnp.dot(concat.astype(jnp.bfloat16), wo_ref[0],
                  preferred_element_type=jnp.float32) + bo_ref[0]
    # dropout_1: identity (eval).  NOTE: no residual connection in the reference.

    # ---- norm_2 + FeedForward ----
    xn2_b = _tnorm(att, ln2a_ref[0], ln2b_ref[0], eps).astype(jnp.bfloat16)
    h1 = jnp.maximum(
        jnp.dot(xn2_b, w1_ref[0], preferred_element_type=jnp.float32)
        + b1_ref[0], 0.0)
    out = jnp.dot(h1.astype(jnp.bfloat16), w2_ref[0],
                  preferred_element_type=jnp.float32) + b2_ref[0]
    # dropout_2: identity (eval).  NOTE: no residual connection in the reference.

    x_scr[...] = out                                 # VMEM layer-to-layer carry

    # Final Encoder NormLayer fused into the last layer step (no extra HBM pass).
    @pl.when(l == pl.num_programs(1) - 1)
    def _():
        o_ref[...] = _tnorm(out, fna_ref[...], fnb_ref[...], eps).reshape(
            bt, seq, D)


# ----------------------------- wrapper ---------------------------------------

def encoder_forward(params, src, mask, *, eps=1e-6, batch_tile=None):
    embed = params["embed"]
    pe = params["pe"]
    heads = params["heads"]
    B, S = src.shape
    D = embed.shape[1]
    L = params["wq"].shape[0]
    d_ff = params["w1"].shape[2]
    assert D % heads == 0

    Bt = B if batch_tile is None else batch_tile
    assert B % Bt == 0
    NB = B // Bt

    # Glue outside the kernel: embedding gather + positional encoding
    # (intended PositionEncoder behaviour; the reference forward returns None).
    x = embed[src].astype(jnp.float32) * jnp.float32(math.sqrt(D)) + pe[None, :S, :]

    def layer_spec(shape):
        nrest = len(shape) - 1
        return pl.BlockSpec((1,) + tuple(shape[1:]),
                            lambda b, l, _n=nrest: (l,) + (0,) * _n)

    def const_spec(shape):
        n = len(shape)
        return pl.BlockSpec(tuple(shape), lambda b, l, _n=n: (0,) * _n)

    kernel = functools.partial(encoder_stack_kernel,
                               heads=heads, eps=eps, bt=Bt, seq=S)

    # Explicit VMEM budget: double-buffered per-layer bf16 weights + batch-tile
    # activation blocks + generous headroom for in-kernel intermediates.
    # Raises v5e's 16 MiB scoped default; capped at v7x's 64 MiB physical VMEM.
    w_layer = 2 * 2 * (3 * D * D + 2 * D * d_ff)            # bf16, 2 buffers
    act = 4 * 4 * (Bt * S * D) + 4 * (Bt * S * d_ff)
    vmem_limit = int(min(w_layer + act + (16 << 20), 64 << 20))

    return pl.pallas_call(
        kernel,
        out_shape=jax.ShapeDtypeStruct((B, S, D), jnp.float32),
        grid=(NB, L),
        in_specs=[
            pl.BlockSpec((Bt, S, D), lambda b, l: (b, 0, 0)),   # x (embedded + PE)
            pl.BlockSpec((Bt, 1, S), lambda b, l: (b, 0, 0)),   # key mask
            layer_spec((L, 1, D)), layer_spec((L, 1, D)),       # ln1 alpha / bias
            layer_spec((L, D, D)), layer_spec((L, 1, D)),       # Wq, bq
            layer_spec((L, D, D)), layer_spec((L, 1, D)),       # Wk, bk
            layer_spec((L, D, D)), layer_spec((L, 1, D)),       # Wo, bo
            layer_spec((L, 1, D)), layer_spec((L, 1, D)),       # ln2 alpha / bias
            layer_spec((L, D, d_ff)), layer_spec((L, 1, d_ff)), # W1, b1
            layer_spec((L, d_ff, D)), layer_spec((L, 1, D)),    # W2, b2
            const_spec((1, D)), const_spec((1, D)),             # final norm a / b
        ],
        out_specs=pl.BlockSpec((Bt, S, D), lambda b, l: (b, 0, 0)),
        scratch_shapes=[
            pltpu.VMEM((Bt * S, D), jnp.float32),               # activation carry
            pltpu.VMEM((Bt * heads, 1, S), jnp.float32),        # hoisted mask bias
        ],
        compiler_params=pltpu.CompilerParams(
            dimension_semantics=("parallel", "arbitrary"),      # batch || , layer seq
            vmem_limit_bytes=vmem_limit),
    )(x, mask,
      params["ln1_a"], params["ln1_b"],
      params["wq"], params["bq"], params["wk"], params["bk"],
      params["wo"], params["bo"],
      params["ln2_a"], params["ln2_b"],
      params["w1"], params["b1"], params["w2"], params["b2"],
      params["norm_a"], params["norm_b"])


# ----------------------------- parameter init --------------------------------

def make_pe(d_model, max_len=80):
    # Reproduces the reference quirk: sin uses 10000^(2i/d), cos uses 10000^(2(i+1)/d).
    pos = jnp.arange(max_len, dtype=jnp.float32)[:, None]
    i = jnp.arange(0, d_model, 2, dtype=jnp.float32)[None, :]
    pe = jnp.zeros((max_len, d_model), jnp.float32)
    pe = pe.at[:, 0::2].set(jnp.sin(pos / jnp.power(10000.0, 2.0 * i / d_model)))
    pe = pe.at[:, 1::2].set(jnp.cos(pos / jnp.power(10000.0, 2.0 * (i + 1.0) / d_model)))
    return pe


def init_params(key, vocab_size, d_model, heads, num_layers, d_ff=2048, max_len=80):
    keys = jax.random.split(key, 1 + num_layers)

    def lin(k2, fan_in, fan_out):
        bound = 1.0 / math.sqrt(fan_in)
        w = jax.random.uniform(k2[0], (fan_out, fan_in), jnp.float32, -bound, bound)
        b = jax.random.uniform(k2[1], (fan_out,), jnp.float32, -bound, bound)
        return w.T, b.reshape(1, fan_out)          # pre-transposed to (in, out)

    wq, bq, wk, bk, wo, bo, w1, b1, w2, b2 = ([] for _ in range(10))
    for l in range(num_layers):
        k = jax.random.split(keys[1 + l], 12)
        a, b_ = lin(k[0:2], d_model, d_model); wq.append(a); bq.append(b_)
        a, b_ = lin(k[2:4], d_model, d_model); wk.append(a); bk.append(b_)
        _ = lin(k[4:6], d_model, d_model)          # v_linear exists in module; unused (ref uses k_linear for v)
        a, b_ = lin(k[6:8], d_model, d_model); wo.append(a); bo.append(b_)
        a, b_ = lin(k[8:10], d_model, d_ff);   w1.append(a); b1.append(b_)
        a, b_ = lin(k[10:12], d_ff, d_model);  w2.append(a); b2.append(b_)

    def stack_w(ws):                               # stacked over layers, bf16 for the MXU
        return jnp.stack(ws, axis=0).astype(jnp.bfloat16)

    def stack_b(bs):                               # (L, 1, fan_out) f32
        return jnp.stack(bs, axis=0)

    ones = jnp.ones((num_layers, 1, d_model), jnp.float32)
    zeros = jnp.zeros((num_layers, 1, d_model), jnp.float32)

    return {
        "embed": jax.random.normal(keys[0], (vocab_size, d_model), jnp.float32),
        "pe": make_pe(d_model, max_len),
        "heads": heads,
        "norm_a": jnp.ones((1, d_model), jnp.float32),
        "norm_b": jnp.zeros((1, d_model), jnp.float32),
        "ln1_a": ones, "ln1_b": zeros, "ln2_a": ones, "ln2_b": zeros,
        "wq": stack_w(wq), "bq": stack_b(bq),
        "wk": stack_w(wk), "bk": stack_b(bk),
        "wo": stack_w(wo), "bo": stack_b(bo),
        "w1": stack_w(w1), "b1": stack_b(b1),
        "w2": stack_w(w2), "b2": stack_b(b2),
    }


# ----------------------------- main -------------------------------------------

if __name__ == "__main__":
    vocab_size, d_model, heads, num_layers, dropout = 50, 32, 4, 2, 0.1
    B, S = 2, 8

    key = jax.random.PRNGKey(0)
    kp, ks = jax.random.split(key)
    params = init_params(kp, vocab_size, d_model, heads, num_layers)

    src = jax.random.randint(ks, (B, S), 0, vocab_size, dtype=jnp.int32)
    mask = jnp.ones((B, 1, S), jnp.int32)          # key mask, broadcast over heads/queries

    out = encoder_forward(params, src, mask)
    out = jax.block_until_ready(out)
    assert out.shape == (B, S, d_model) and out.dtype == jnp.float32
    assert bool(jnp.all(jnp.isfinite(out)))
    print("KERNEL_OK")
</pallas_src>

<mosaic_0001>
module attributes {stable_mosaic.version = 11 : i64} {
  func.func @encoder_stack_kernel(%arg0: i32, %arg1: i32, %arg2: memref<2x8x32xf32, #tpu.memory_space<vmem>>, %arg3: memref<2x1x8xi32, #tpu.memory_space<vmem>>, %arg4: memref<1x1x32xf32, #tpu.memory_space<vmem>>, %arg5: memref<1x1x32xf32, #tpu.memory_space<vmem>>, %arg6: memref<1x32x32xbf16, #tpu.memory_space<vmem>>, %arg7: memref<1x1x32xf32, #tpu.memory_space<vmem>>, %arg8: memref<1x32x32xbf16, #tpu.memory_space<vmem>>, %arg9: memref<1x1x32xf32, #tpu.memory_space<vmem>>, %arg10: memref<1x32x32xbf16, #tpu.memory_space<vmem>>, %arg11: memref<1x1x32xf32, #tpu.memory_space<vmem>>, %arg12: memref<1x1x32xf32, #tpu.memory_space<vmem>>, %arg13: memref<1x1x32xf32, #tpu.memory_space<vmem>>, %arg14: memref<1x32x2048xbf16, #tpu.memory_space<vmem>>, %arg15: memref<1x1x2048xf32, #tpu.memory_space<vmem>>, %arg16: memref<1x2048x32xbf16, #tpu.memory_space<vmem>>, %arg17: memref<1x1x32xf32, #tpu.memory_space<vmem>>, %arg18: memref<1x32xf32, #tpu.memory_space<vmem>>, %arg19: memref<1x32xf32, #tpu.memory_space<vmem>>, %arg20: memref<2x8x32xf32, #tpu.memory_space<vmem>>, %arg21: memref<16x32xf32, #tpu.memory_space<vmem>>, %arg22: memref<8x1x8xf32, #tpu.memory_space<vmem>>) attributes {dimension_semantics = [#tpu.dimension_semantics<parallel>, #tpu.dimension_semantics<arbitrary>], iteration_bounds = array<i64: 1, 2>, scalar_prefetch = 0 : i64, scratch_operands = 2 : i64, tpu.core_type = #tpu.core_type<tc>, window_params = [{transform_indices = @transform_0, window_bounds = array<i64: 2, 8, 32>}, {transform_indices = @transform_1, window_bounds = array<i64: 2, 1, 8>}, {transform_indices = @transform_2, window_bounds = array<i64: 1, 1, 32>}, {transform_indices = @transform_3, window_bounds = array<i64: 1, 1, 32>}, {transform_indices = @transform_4, window_bounds = array<i64: 1, 32, 32>}, {transform_indices = @transform_5, window_bounds = array<i64: 1, 1, 32>}, {transform_indices = @transform_6, window_bounds = array<i64: 1, 32, 32>}, {transform_indices = @transform_7, window_bounds = array<i64: 1, 1, 32>}, {transform_indices = @transform_8, window_bounds = array<i64: 1, 32, 32>}, {transform_indices = @transform_9, window_bounds = array<i64: 1, 1, 32>}, {transform_indices = @transform_10, window_bounds = array<i64: 1, 1, 32>}, {transform_indices = @transform_11, window_bounds = array<i64: 1, 1, 32>}, {transform_indices = @transform_12, window_bounds = array<i64: 1, 32, 2048>}, {transform_indices = @transform_13, window_bounds = array<i64: 1, 1, 2048>}, {transform_indices = @transform_14, window_bounds = array<i64: 1, 2048, 32>}, {transform_indices = @transform_15, window_bounds = array<i64: 1, 1, 32>}, {pipeline_mode = #tpu.pipeline_mode<synchronous>, transform_indices = @transform_16, window_bounds = array<i64: 1, 32>}, {pipeline_mode = #tpu.pipeline_mode<synchronous>, transform_indices = @transform_17, window_bounds = array<i64: 1, 32>}, {transform_indices = @transform_18, window_bounds = array<i64: 2, 8, 32>}]} {
    %c0_i32 = arith.constant 0 : i32
    %0 = arith.cmpi eq, %arg1, %c0_i32 : i32
    %1 = arith.extui %0 : i1 to i32
    %c0_i32_0 = arith.constant 0 : i32
    %2 = arith.cmpi ne, %1, %c0_i32_0 : i32
    scf.if %2 {
      %c0_70 = arith.constant 0 : index
      %c0_71 = arith.constant 0 : index
      %c0_72 = arith.constant 0 : index
      %126 = vector.load %arg2[%c0_70, %c0_71, %c0_72] : memref<2x8x32xf32, #tpu.memory_space<vmem>>, vector<2x8x32xf32>
      %127 = vector.shape_cast %126 : vector<2x8x32xf32> to vector<16x32xf32>
      %c0_73 = arith.constant 0 : index
      %c0_74 = arith.constant 0 : index
      %128 = vector.load %arg21[%c0_73, %c0_74] : memref<16x32xf32, #tpu.memory_space<vmem>>, vector<16x32xf32>
      tpu.vector_store %arg21[%c0_73, %c0_74], %127 {strides = array<i32>} : memref<16x32xf32, #tpu.memory_space<vmem>>, vector<16x32xf32>,
      %c0_75 = arith.constant 0 : index
      %c0_76 = arith.constant 0 : index
      %c0_77 = arith.constant 0 : index
      %129 = vector.load %arg3[%c0_75, %c0_76, %c0_77] : memref<2x1x8xi32, #tpu.memory_space<vmem>>, vector<2x1x8xi32>
      %c0_i32_78 = arith.constant 0 : i32
      %130 = vector.broadcast %c0_i32_78 : i32 to vector<2x1x8xi32>
      %131 = arith.cmpi eq, %129, %130 : vector<2x1x8xi32>
      %cst_79 = arith.constant -1.000000e+09 : f32
      %cst_80 = arith.constant 0.000000e+00 : f32
      %132 = vector.broadcast %cst_79 : f32 to vector<2x1x8xf32>
      %133 = vector.broadcast %cst_80 : f32 to vector<2x1x8xf32>
      %134 = arith.select %131, %132, %133 : vector<2x1x8xi1>, vector<2x1x8xf32>
      %135 = vector.shape_cast %134 : vector<2x1x8xf32> to vector<2x1x1x8xf32>
      %136 = vector.shape_cast %135 : vector<2x1x1x8xf32> to vector<2x1x1x8xf32>
      %137 = vector.broadcast %136 : vector<2x1x1x8xf32> to vector<2x4x1x8xf32>
      %138 = vector.shape_cast %137 : vector<2x4x1x8xf32> to vector<8x1x8xf32>
      %c0_81 = arith.constant 0 : index
      %c0_82 = arith.constant 0 : index
      %c0_83 = arith.constant 0 : index
      %139 = vector.load %arg22[%c0_81, %c0_82, %c0_83] : memref<8x1x8xf32, #tpu.memory_space<vmem>>, vector<8x1x8xf32>
      tpu.vector_store %arg22[%c0_81, %c0_82, %c0_83], %138 {strides = array<i32>} : memref<8x1x8xf32, #tpu.memory_space<vmem>>, vector<8x1x8xf32>,
    } else {
    }
    %c0 = arith.constant 0 : index
    %c0_1 = arith.constant 0 : index
    %3 = vector.load %arg21[%c0, %c0_1] : memref<16x32xf32, #tpu.memory_space<vmem>>, vector<16x32xf32>
    %c0_2 = arith.constant 0 : index
    %c0_3 = arith.constant 0 : index
    %c0_4 = arith.constant 0 : index
    %4 = vector.load %arg4[%c0_2, %c0_3, %c0_4] : memref<1x1x32xf32, #tpu.memory_space<vmem>>, vector<1x1x32xf32>
    %5 = vector.shape_cast %4 : vector<1x1x32xf32> to vector<1x32xf32>
    %c0_5 = arith.constant 0 : index
    %c0_6 = arith.constant 0 : index
    %c0_7 = arith.constant 0 : index
    %6 = vector.load %arg5[%c0_5, %c0_6, %c0_7] : memref<1x1x32xf32, #tpu.memory_space<vmem>>, vector<1x1x32xf32>
    %7 = vector.shape_cast %6 : vector<1x1x32xf32> to vector<1x32xf32>
    %cst = arith.constant dense<0.000000e+00> : vector<16xf32>
    %8 = vector.multi_reduction <add>, %3, %cst [1] : vector<16x32xf32> to vector<16xf32>
    %9 = vector.shape_cast %8 : vector<16xf32> to vector<16x1xf32>
    %cst_8 = arith.constant 3.200000e+01 : f32
    %10 = vector.broadcast %cst_8 : f32 to vector<16x1xf32>
    %11 = arith.divf %9, %10 : vector<16x1xf32>
    %12 = vector.broadcast %11 : vector<16x1xf32> to vector<16x32xf32>
    %13 = arith.subf %3, %12 : vector<16x32xf32>
    %14 = arith.mulf %13, %13 : vector<16x32xf32>
    %cst_9 = arith.constant dense<0.000000e+00> : vector<16xf32>
    %15 = vector.multi_reduction <add>, %14, %cst_9 [1] : vector<16x32xf32> to vector<16xf32>
    %16 = vector.shape_cast %15 : vector<16xf32> to vector<16x1xf32>
    %cst_10 = arith.constant 0.0322580636 : f32
    %17 = vector.broadcast %cst_10 : f32 to vector<16x1xf32>
    %18 = arith.mulf %16, %17 : vector<16x1xf32>
    %19 = math.rsqrt %18 : vector<16x1xf32>
    %20 = vector.broadcast %19 : vector<16x1xf32> to vector<16x32xf32>
    %21 = arith.mulf %13, %20 : vector<16x32xf32>
    %cst_11 = arith.constant 9.99999997E-7 : f32
    %22 = vector.broadcast %cst_11 : f32 to vector<16x32xf32>
    %23 = arith.addf %21, %22 : vector<16x32xf32>
    %24 = vector.broadcast %5 : vector<1x32xf32> to vector<16x32xf32>
    %25 = arith.mulf %24, %23 : vector<16x32xf32>
    %26 = vector.broadcast %7 : vector<1x32xf32> to vector<16x32xf32>
    %27 = arith.addf %25, %26 : vector<16x32xf32>
    %28 = arith.truncf %27 : vector<16x32xf32> to vector<16x32xbf16>
    %c0_12 = arith.constant 0 : index
    %c0_13 = arith.constant 0 : index
    %c0_14 = arith.constant 0 : index
    %29 = vector.load %arg6[%c0_12, %c0_13, %c0_14] : memref<1x32x32xbf16, #tpu.memory_space<vmem>>, vector<1x32x32xbf16>
    %30 = vector.shape_cast %29 : vector<1x32x32xbf16> to vector<32x32xbf16>
    %cst_15 = arith.constant dense<0.000000e+00> : vector<16x32xf32>
    %31 = tpu.matmul %28, %30, %cst_15 {dimension_numbers = #tpu.dot_dimension_numbers<[1], [0], [0], [1], [0, 0, 1, 1], [], []>} : vector<16x32xbf16>, vector<32x32xbf16>, vector<16x32xf32> -> vector<16x32xf32>
    %c0_16 = arith.constant 0 : index
    %c0_17 = arith.constant 0 : index
    %c0_18 = arith.constant 0 : index
    %32 = vector.load %arg7[%c0_16, %c0_17, %c0_18] : memref<1x1x32xf32, #tpu.memory_space<vmem>>, vector<1x1x32xf32>
    %33 = vector.shape_cast %32 : vector<1x1x32xf32> to vector<1x32xf32>
    %34 = vector.broadcast %33 : vector<1x32xf32> to vector<16x32xf32>
    %35 = arith.addf %31, %34 : vector<16x32xf32>
    %c0_19 = arith.constant 0 : index
    %c0_20 = arith.constant 0 : index
    %c0_21 = arith.constant 0 : index
    %36 = vector.load %arg8[%c0_19, %c0_20, %c0_21] : memref<1x32x32xbf16, #tpu.memory_space<vmem>>, vector<1x32x32xbf16>
    %37 = vector.shape_cast %36 : vector<1x32x32xbf16> to vector<32x32xbf16>
    %cst_22 = arith.constant dense<0.000000e+00> : vector<16x32xf32>
    %38 = tpu.matmul %28, %37, %cst_22 {dimension_numbers = #tpu.dot_dimension_numbers<[1], [0], [0], [1], [0, 0, 1, 1], [], []>} : vector<16x32xbf16>, vector<32x32xbf16>, vector<16x32xf32> -> vector<16x32xf32>
    %c0_23 = arith.constant 0 : index
    %c0_24 = arith.constant 0 : index
    %c0_25 = arith.constant 0 : index
    %39 = vector.load %arg9[%c0_23, %c0_24, %c0_25] : memref<1x1x32xf32, #tpu.memory_space<vmem>>, vector<1x1x32xf32>
    %40 = vector.shape_cast %39 : vector<1x1x32xf32> to vector<1x32xf32>
    %41 = vector.broadcast %40 : vector<1x32xf32> to vector<16x32xf32>
    %42 = arith.addf %38, %41 : vector<16x32xf32>
    %cst_26 = arith.constant 0.353553385 : f32
    %43 = vector.broadcast %cst_26 : f32 to vector<16x32xf32>
    %44 = arith.mulf %35, %43 : vector<16x32xf32>
    %45 = vector.shape_cast %44 : vector<16x32xf32> to vector<2x8x4x8xf32>
    %46 = tpu.transpose %45, [0, 2, 1, 3] : vector<2x8x4x8xf32> -> vector<2x4x8x8xf32>
    %47 = vector.shape_cast %46 : vector<2x4x8x8xf32> to vector<8x8x8xf32>
    %48 = arith.truncf %47 : vector<8x8x8xf32> to vector<8x8x8xbf16>
    %49 = vector.shape_cast %42 : vector<16x32xf32> to vector<2x8x4x8xf32>
    %50 = tpu.transpose %49, [0, 2, 1, 3] : vector<2x8x4x8xf32> -> vector<2x4x8x8xf32>
    %51 = vector.shape_cast %50 : vector<2x4x8x8xf32> to vector<8x8x8xf32>
    %52 = arith.truncf %51 : vector<8x8x8xf32> to vector<8x8x8xbf16>
    "tpu.trace_start"() <{level = 10 : i32, message = "hqd,hkd->hqk"}> : () -> ()
    %cst_27 = arith.constant dense<0.000000e+00> : vector<8x8x8xf32>
    %53 = tpu.matmul %48, %52, %cst_27 {dimension_numbers = #tpu.dot_dimension_numbers<[2], [2], [1], [1], [0, 0, 0, 1, 1, 1], [0], [0]>} : vector<8x8x8xbf16>, vector<8x8x8xbf16>, vector<8x8x8xf32> -> vector<8x8x8xf32>
    "tpu.trace_stop"() : () -> ()
    %c0_28 = arith.constant 0 : index
    %c0_29 = arith.constant 0 : index
    %c0_30 = arith.constant 0 : index
    %54 = vector.load %arg22[%c0_28, %c0_29, %c0_30] : memref<8x1x8xf32, #tpu.memory_space<vmem>>, vector<8x1x8xf32>
    %55 = vector.broadcast %54 : vector<8x1x8xf32> to vector<8x8x8xf32>
    %56 = arith.addf %53, %55 : vector<8x8x8xf32>
    %cst_31 = arith.constant dense<0xFF800000> : vector<8x8xf32>
    %57 = vector.multi_reduction <maximumf>, %56, %cst_31 [2] : vector<8x8x8xf32> to vector<8x8xf32>
    %58 = vector.shape_cast %57 : vector<8x8xf32> to vector<8x8x1xf32>
    %59 = vector.broadcast %58 : vector<8x8x1xf32> to vector<8x8x8xf32>
    %60 = arith.subf %56, %59 : vector<8x8x8xf32>
    %61 = math.exp %60 : vector<8x8x8xf32>
    %cst_32 = arith.constant dense<0.000000e+00> : vector<8x8xf32>
    %62 = vector.multi_reduction <add>, %61, %cst_32 [2] : vector<8x8x8xf32> to vector<8x8xf32>
    %63 = vector.shape_cast %62 : vector<8x8xf32> to vector<8x8x1xf32>
    %64 = tpu.reciprocal %63 {approx = true} : vector<8x8x1xf32> -> vector<8x8x1xf32>
    %65 = vector.broadcast %64 : vector<8x8x1xf32> to vector<8x8x8xf32>
    %66 = arith.mulf %61, %65 : vector<8x8x8xf32>
    %67 = arith.truncf %66 : vector<8x8x8xf32> to vector<8x8x8xbf16>
    "tpu.trace_start"() <{level = 10 : i32, message = "hqk,hkd->hqd"}> : () -> ()
    %cst_33 = arith.constant dense<0.000000e+00> : vector<8x8x8xf32>
    %68 = tpu.matmul %67, %52, %cst_33 {dimension_numbers = #tpu.dot_dimension_numbers<[2], [1], [1], [2], [0, 0, 0, 1, 1, 2], [0], [0]>} : vector<8x8x8xbf16>, vector<8x8x8xbf16>, vector<8x8x8xf32> -> vector<8x8x8xf32>
    "tpu.trace_stop"() : () -> ()
    %69 = vector.shape_cast %68 : vector<8x8x8xf32> to vector<2x4x8x8xf32>
    %70 = tpu.transpose %69, [0, 2, 1, 3] : vector<2x4x8x8xf32> -> vector<2x8x4x8xf32>
    %71 = vector.shape_cast %70 : vector<2x8x4x8xf32> to vector<16x32xf32>
    %72 = arith.truncf %71 : vector<16x32xf32> to vector<16x32xbf16>
    %c0_34 = arith.constant 0 : index
    %c0_35 = arith.constant 0 : index
    %c0_36 = arith.constant 0 : index
    %73 = vector.load %arg10[%c0_34, %c0_35, %c0_36] : memref<1x32x32xbf16, #tpu.memory_space<vmem>>, vector<1x32x32xbf16>
    %74 = vector.shape_cast %73 : vector<1x32x32xbf16> to vector<32x32xbf16>
    %cst_37 = arith.constant dense<0.000000e+00> : vector<16x32xf32>
    %75 = tpu.matmul %72, %74, %cst_37 {dimension_numbers = #tpu.dot_dimension_numbers<[1], [0], [0], [1], [0, 0, 1, 1], [], []>} : vector<16x32xbf16>, vector<32x32xbf16>, vector<16x32xf32> -> vector<16x32xf32>
    %c0_38 = arith.constant 0 : index
    %c0_39 = arith.constant 0 : index
    %c0_40 = arith.constant 0 : index
    %76 = vector.load %arg11[%c0_38, %c0_39, %c0_40] : memref<1x1x32xf32, #tpu.memory_space<vmem>>, vector<1x1x32xf32>
    %77 = vector.shape_cast %76 : vector<1x1x32xf32> to vector<1x32xf32>
    %78 = vector.broadcast %77 : vector<1x32xf32> to vector<16x32xf32>
    %79 = arith.addf %75, %78 : vector<16x32xf32>
    %c0_41 = arith.constant 0 : index
    %c0_42 = arith.constant 0 : index
    %c0_43 = arith.constant 0 : index
    %80 = vector.load %arg12[%c0_41, %c0_42, %c0_43] : memref<1x1x32xf32, #tpu.memory_space<vmem>>, vector<1x1x32xf32>
    %81 = vector.shape_cast %80 : vector<1x1x32xf32> to vector<1x32xf32>
    %c0_44 = arith.constant 0 : index
    %c0_45 = arith.constant 0 : index
    %c0_46 = arith.constant 0 : index
    %82 = vector.load %arg13[%c0_44, %c0_45, %c0_46] : memref<1x1x32xf32, #tpu.memory_space<vmem>>, vector<1x1x32xf32>
    %83 = vector.shape_cast %82 : vector<1x1x32xf32> to vector<1x32xf32>
    %cst_47 = arith.constant dense<0.000000e+00> : vector<16xf32>
    %84 = vector.multi_reduction <add>, %79, %cst_47 [1] : vector<16x32xf32> to vector<16xf32>
    %85 = vector.shape_cast %84 : vector<16xf32> to vector<16x1xf32>
    %cst_48 = arith.constant 3.200000e+01 : f32
    %86 = vector.broadcast %cst_48 : f32 to vector<16x1xf32>
    %87 = arith.divf %85, %86 : vector<16x1xf32>
    %88 = vector.broadcast %87 : vector<16x1xf32> to vector<16x32xf32>
    %89 = arith.subf %79, %88 : vector<16x32xf32>
    %90 = arith.mulf %89, %89 : vector<16x32xf32>
    %cst_49 = arith.constant dense<0.000000e+00> : vector<16xf32>
    %91 = vector.multi_reduction <add>, %90, %cst_49 [1] : vector<16x32xf32> to vector<16xf32>
    %92 = vector.shape_cast %91 : vector<16xf32> to vector<16x1xf32>
    %cst_50 = arith.constant 0.0322580636 : f32
    %93 = vector.broadcast %cst_50 : f32 to vector<16x1xf32>
    %94 = arith.mulf %92, %93 : vector<16x1xf32>
    %95 = math.rsqrt %94 : vector<16x1xf32>
    %96 = vector.broadcast %95 : vector<16x1xf32> to vector<16x32xf32>
    %97 = arith.mulf %89, %96 : vector<16x32xf32>
    %cst_51 = arith.constant 9.99999997E-7 : f32
    %98 = vector.broadcast %cst_51 : f32 to vector<16x32xf32>
    %99 = arith.addf %97, %98 : vector<16x32xf32>
    %100 = vector.broadcast %81 : vector<1x32xf32> to vector<16x32xf32>
    %101 = arith.mulf %100, %99 : vector<16x32xf32>
    %102 = vector.broadcast %83 : vector<1x32xf32> to vector<16x32xf32>
    %103 = arith.addf %101, %102 : vector<16x32xf32>
    %104 = arith.truncf %103 : vector<16x32xf32> to vector<16x32xbf16>
    %c0_52 = arith.constant 0 : index
    %c0_53 = arith.constant 0 : index
    %c0_54 = arith.constant 0 : index
    %105 = vector.load %arg14[%c0_52, %c0_53, %c0_54] : memref<1x32x2048xbf16, #tpu.memory_space<vmem>>, vector<1x32x2048xbf16>
    %106 = vector.shape_cast %105 : vector<1x32x2048xbf16> to vector<32x2048xbf16>
    %cst_55 = arith.constant dense<0.000000e+00> : vector<16x2048xf32>
    %107 = tpu.matmul %104, %106, %cst_55 {dimension_numbers = #tpu.dot_dimension_numbers<[1], [0], [0], [1], [0, 0, 1, 1], [], []>} : vector<16x32xbf16>, vector<32x2048xbf16>, vector<16x2048xf32> -> vector<16x2048xf32>
    %c0_56 = arith.constant 0 : index
    %c0_57 = arith.constant 0 : index
    %c0_58 = arith.constant 0 : index
    %108 = vector.load %arg15[%c0_56, %c0_57, %c0_58] : memref<1x1x2048xf32, #tpu.memory_space<vmem>>, vector<1x1x2048xf32>
    %109 = vector.shape_cast %108 : vector<1x1x2048xf32> to vector<1x2048xf32>
    %110 = vector.broadcast %109 : vector<1x2048xf32> to vector<16x2048xf32>
    %111 = arith.addf %107, %110 : vector<16x2048xf32>
    %cst_59 = arith.constant 0.000000e+00 : f32
    %112 = vector.broadcast %cst_59 : f32 to vector<16x2048xf32>
    %113 = arith.maximumf %111, %112 : vector<16x2048xf32>
    %114 = arith.truncf %113 : vector<16x2048xf32> to vector<16x2048xbf16>
    %c0_60 = arith.constant 0 : index
    %c0_61 = arith.constant 0 : index
    %c0_62 = arith.constant 0 : index
    %115 = vector.load %arg16[%c0_60, %c0_61, %c0_62] : memref<1x2048x32xbf16, #tpu.memory_space<vmem>>, vector<1x2048x32xbf16>
    %116 = vector.shape_cast %115 : vector<1x2048x32xbf16> to vector<2048x32xbf16>
    %cst_63 = arith.constant dense<0.000000e+00> : vector<16x32xf32>
    %117 = tpu.matmul %114, %116, %cst_63 {dimension_numbers = #tpu.dot_dimension_numbers<[1], [0], [0], [1], [0, 0, 1, 1], [], []>} : vector<16x2048xbf16>, vector<2048x32xbf16>, vector<16x32xf32> -> vector<16x32xf32>
    %c0_64 = arith.constant 0 : index
    %c0_65 = arith.constant 0 : index
    %c0_66 = arith.constant 0 : index
    %118 = vector.load %arg17[%c0_64, %c0_65, %c0_66] : memref<1x1x32xf32, #tpu.memory_space<vmem>>, vector<1x1x32xf32>
    %119 = vector.shape_cast %118 : vector<1x1x32xf32> to vector<1x32xf32>
    %120 = vector.broadcast %119 : vector<1x32xf32> to vector<16x32xf32>
    %121 = arith.addf %117, %120 : vector<16x32xf32>
    %c0_67 = arith.constant 0 : index
    %c0_68 = arith.constant 0 : index
    %122 = vector.load %arg21[%c0_67, %c0_68] : memref<16x32xf32, #tpu.memory_space<vmem>>, vector<16x32xf32>
    tpu.vector_store %arg21[%c0_67, %c0_68], %121 {strides = array<i32>} : memref<16x32xf32, #tpu.memory_space<vmem>>, vector<16x32xf32>,
    %c1_i32 = arith.constant 1 : i32
    %123 = arith.cmpi eq, %arg1, %c1_i32 : i32
    %124 = arith.extui %123 : i1 to i32
    %c0_i32_69 = arith.constant 0 : i32
    %125 = arith.cmpi ne, %124, %c0_i32_69 : i32
    scf.if %125 {
      %c0_70 = arith.constant 0 : index
      %c0_71 = arith.constant 0 : index
      %126 = vector.load %arg18[%c0_70, %c0_71] : memref<1x32xf32, #tpu.memory_space<vmem>>, vector<1x32xf32>
      %c0_72 = arith.constant 0 : index
      %c0_73 = arith.constant 0 : index
      %127 = vector.load %arg19[%c0_72, %c0_73] : memref<1x32xf32, #tpu.memory_space<vmem>>, vector<1x32xf32>
      %cst_74 = arith.constant dense<0.000000e+00> : vector<16xf32>
      %128 = vector.multi_reduction <add>, %121, %cst_74 [1] : vector<16x32xf32> to vector<16xf32>
      %129 = vector.shape_cast %128 : vector<16xf32> to vector<16x1xf32>
      %cst_75 = arith.constant 3.200000e+01 : f32
      %130 = vector.broadcast %cst_75 : f32 to vector<16x1xf32>
      %131 = arith.divf %129, %130 : vector<16x1xf32>
      %132 = vector.broadcast %131 : vector<16x1xf32> to vector<16x32xf32>
      %133 = arith.subf %121, %132 : vector<16x32xf32>
      %134 = arith.mulf %133, %133 : vector<16x32xf32>
      %cst_76 = arith.constant dense<0.000000e+00> : vector<16xf32>
      %135 = vector.multi_reduction <add>, %134, %cst_76 [1] : vector<16x32xf32> to vector<16xf32>
      %136 = vector.shape_cast %135 : vector<16xf32> to vector<16x1xf32>
      %cst_77 = arith.constant 0.0322580636 : f32
      %137 = vector.broadcast %cst_77 : f32 to vector<16x1xf32>
      %138 = arith.mulf %136, %137 : vector<16x1xf32>
      %139 = math.rsqrt %138 : vector<16x1xf32>
      %140 = vector.broadcast %139 : vector<16x1xf32> to vector<16x32xf32>
      %141 = arith.mulf %133, %140 : vector<16x32xf32>
      %cst_78 = arith.constant 9.99999997E-7 : f32
      %142 = vector.broadcast %cst_78 : f32 to vector<16x32xf32>
      %143 = arith.addf %141, %142 : vector<16x32xf32>
      %144 = vector.broadcast %126 : vector<1x32xf32> to vector<16x32xf32>
      %145 = arith.mulf %144, %143 : vector<16x32xf32>
      %146 = vector.broadcast %127 : vector<1x32xf32> to vector<16x32xf32>
      %147 = arith.addf %145, %146 : vector<16x32xf32>
      %148 = vector.shape_cast %147 : vector<16x32xf32> to vector<2x8x32xf32>
      %c0_79 = arith.constant 0 : index
      %c0_80 = arith.constant 0 : index
      %c0_81 = arith.constant 0 : index
      %149 = vector.load %arg20[%c0_79, %c0_80, %c0_81] : memref<2x8x32xf32, #tpu.memory_space<vmem>>, vector<2x8x32xf32>
      tpu.vector_store %arg20[%c0_79, %c0_80, %c0_81], %148 {strides = array<i32>} : memref<2x8x32xf32, #tpu.memory_space<vmem>>, vector<2x8x32xf32>,
    } else {
    }
    return
  }
  func.func @transform_0(%arg0: i32, %arg1: i32) -> (i32, i32, i32) {
    %c0_i32 = arith.constant 0 : i32
    %c0_i32_0 = arith.constant 0 : i32
    %c0_i32_1 = arith.constant 0 : i32
    return %arg0, %c0_i32, %c0_i32_0 : i32, i32, i32
  }
  func.func @transform_1(%arg0: i32, %arg1: i32) -> (i32, i32, i32) {
    %c0_i32 = arith.constant 0 : i32
    %c0_i32_0 = arith.constant 0 : i32
    %c0_i32_1 = arith.constant 0 : i32
    return %arg0, %c0_i32, %c0_i32_0 : i32, i32, i32
  }
  func.func @transform_2(%arg0: i32, %arg1: i32) -> (i32, i32, i32) {
    %c0_i32 = arith.constant 0 : i32
    %c0_i32_0 = arith.constant 0 : i32
    %c0_i32_1 = arith.constant 0 : i32
    return %arg1, %c0_i32, %c0_i32_0 : i32, i32, i32
  }
  func.func @transform_3(%arg0: i32, %arg1: i32) -> (i32, i32, i32) {
    %c0_i32 = arith.constant 0 : i32
    %c0_i32_0 = arith.constant 0 : i32
    %c0_i32_1 = arith.constant 0 : i32
    return %arg1, %c0_i32, %c0_i32_0 : i32, i32, i32
  }
  func.func @transform_4(%arg0: i32, %arg1: i32) -> (i32, i32, i32) {
    %c0_i32 = arith.constant 0 : i32
    %c0_i32_0 = arith.constant 0 : i32
    %c0_i32_1 = arith.constant 0 : i32
    return %arg1, %c0_i32, %c0_i32_0 : i32, i32, i32
  }
  func.func @transform_5(%arg0: i32, %arg1: i32) -> (i32, i32, i32) {
    %c0_i32 = arith.constant 0 : i32
    %c0_i32_0 = arith.constant 0 : i32
    %c0_i32_1 = arith.constant 0 : i32
    return %arg1, %c0_i32, %c0_i32_0 : i32, i32, i32
  }
  func.func @transform_6(%arg0: i32, %arg1: i32) -> (i32, i32, i32) {
    %c0_i32 = arith.constant 0 : i32
    %c0_i32_0 = arith.constant 0 : i32
    %c0_i32_1 = arith.constant 0 : i32
    return %arg1, %c0_i32, %c0_i32_0 : i32, i32, i32
  }
  func.func @transform_7(%arg0: i32, %arg1: i32) -> (i32, i32, i32) {
    %c0_i32 = arith.constant 0 : i32
    %c0_i32_0 = arith.constant 0 : i32
    %c0_i32_1 = arith.constant 0 : i32
    return %arg1, %c0_i32, %c0_i32_0 : i32, i32, i32
  }
  func.func @transform_8(%arg0: i32, %arg1: i32) -> (i32, i32, i32) {
    %c0_i32 = arith.constant 0 : i32
    %c0_i32_0 = arith.constant 0 : i32
    %c0_i32_1 = arith.constant 0 : i32
    return %arg1, %c0_i32, %c0_i32_0 : i32, i32, i32
  }
  func.func @transform_9(%arg0: i32, %arg1: i32) -> (i32, i32, i32) {
    %c0_i32 = arith.constant 0 : i32
    %c0_i32_0 = arith.constant 0 : i32
    %c0_i32_1 = arith.constant 0 : i32
    return %arg1, %c0_i32, %c0_i32_0 : i32, i32, i32
  }
  func.func @transform_10(%arg0: i32, %arg1: i32) -> (i32, i32, i32) {
    %c0_i32 = arith.constant 0 : i32
    %c0_i32_0 = arith.constant 0 : i32
    %c0_i32_1 = arith.constant 0 : i32
    return %arg1, %c0_i32, %c0_i32_0 : i32, i32, i32
  }
  func.func @transform_11(%arg0: i32, %arg1: i32) -> (i32, i32, i32) {
    %c0_i32 = arith.constant 0 : i32
    %c0_i32_0 = arith.constant 0 : i32
    %c0_i32_1 = arith.constant 0 : i32
    return %arg1, %c0_i32, %c0_i32_0 : i32, i32, i32
  }
  func.func @transform_12(%arg0: i32, %arg1: i32) -> (i32, i32, i32) {
    %c0_i32 = arith.constant 0 : i32
    %c0_i32_0 = arith.constant 0 : i32
    %c0_i32_1 = arith.constant 0 : i32
    return %arg1, %c0_i32, %c0_i32_0 : i32, i32, i32
  }
  func.func @transform_13(%arg0: i32, %arg1: i32) -> (i32, i32, i32) {
    %c0_i32 = arith.constant 0 : i32
    %c0_i32_0 = arith.constant 0 : i32
    %c0_i32_1 = arith.constant 0 : i32
    return %arg1, %c0_i32, %c0_i32_0 : i32, i32, i32
  }
  func.func @transform_14(%arg0: i32, %arg1: i32) -> (i32, i32, i32) {
    %c0_i32 = arith.constant 0 : i32
    %c0_i32_0 = arith.constant 0 : i32
    %c0_i32_1 = arith.constant 0 : i32
    return %arg1, %c0_i32, %c0_i32_0 : i32, i32, i32
  }
  func.func @transform_15(%arg0: i32, %arg1: i32) -> (i32, i32, i32) {
    %c0_i32 = arith.constant 0 : i32
    %c0_i32_0 = arith.constant 0 : i32
    %c0_i32_1 = arith.constant 0 : i32
    return %arg1, %c0_i32, %c0_i32_0 : i32, i32, i32
  }
  func.func @transform_16(%arg0: i32, %arg1: i32) -> (i32, i32) {
    %c0_i32 = arith.constant 0 : i32
    %c0_i32_0 = arith.constant 0 : i32
    %c0_i32_1 = arith.constant 0 : i32
    return %c0_i32, %c0_i32_0 : i32, i32
  }
  func.func @transform_17(%arg0: i32, %arg1: i32) -> (i32, i32) {
    %c0_i32 = arith.constant 0 : i32
    %c0_i32_0 = arith.constant 0 : i32
    %c0_i32_1 = arith.constant 0 : i32
    return %c0_i32, %c0_i32_0 : i32, i32
  }
  func.func @transform_18(%arg0: i32, %arg1: i32) -> (i32, i32, i32) {
    %c0_i32 = arith.constant 0 : i32
    %c0_i32_0 = arith.constant 0 : i32
    %c0_i32_1 = arith.constant 0 : i32
    return %arg0, %c0_i32, %c0_i32_0 : i32, i32, i32
  }
}

</mosaic_0001>

<bundles_post_ra>
// kernel: tpu_custom_call.1
= control target key start
LH: loop header
LB: loop body
LE: loop exit
PB: predicated region body
PF: predicated region fallthrough
CT: control target
= control target key end

     0   :  { %s7040_s0 = inlined_call_operand.vmem [shape: f32[2,8,32], index: 0, kind: input, shape index: {}]   ;;  %s7041_s1 = inlined_call_operand.vmem [shape: s32[2,1,8], index: 1, kind: input, shape index: {}]   ;;  %s7042_s2 = inlined_call_operand.vmem [shape: f32[2,1,32], index: 2, kind: input, shape index: {}]   ;;  %s7043_s3 = inlined_call_operand.vmem [shape: f32[2,1,32], index: 3, kind: input, shape index: {}]   ;;  %s7044_s4 = inlined_call_operand.vmem [shape: bf16[2,32,32], index: 4, kind: input, shape index: {}]   ;;  %s7045_s5 = inlined_call_operand.vmem [shape: f32[2,1,32], index: 5, kind: input, shape index: {}]   ;;  %s7046_s6 = inlined_call_operand.vmem [shape: bf16[2,32,32], index: 6, kind: input, shape index: {}]   ;;  %s7047_s7 = inlined_call_operand.vmem [shape: f32[2,1,32], index: 7, kind: input, shape index: {}]   ;;  %s7048_s8 = inlined_call_operand.vmem [shape: bf16[2,32,32], index: 8, kind: input, shape index: {}]   ;;  %s7049_s9 = inlined_call_operand.vmem [shape: f32[2,1,32], index: 9, kind: input, shape index: {}]   ;;  %s7050_s10 = inlined_call_operand.vmem [shape: f32[2,1,32], index: 10, kind: input, shape index: {}]   ;;  %s7051_s11 = inlined_call_operand.vmem [shape: f32[2,1,32], index: 11, kind: input, shape index: {}]   ;;  %s7052_s12 = inlined_call_operand.vmem [shape: bf16[2,32,2048], index: 12, kind: input, shape index: {}]   ;;  %s7053_s13 = inlined_call_operand.vmem [shape: f32[2,1,2048], index: 13, kind: input, shape index: {}]   ;;  %s7054_s14 = inlined_call_operand.vmem [shape: bf16[2,2048,32], index: 14, kind: input, shape index: {}]   ;;  %s7055_s15 = inlined_call_operand.vmem [shape: f32[2,1,32], index: 15, kind: input, shape index: {}]   ;;  %s7056_s16 = inlined_call_operand.vmem [shape: f32[1,32], index: 16, kind: input, shape index: {}]   ;;  %s7057_s17 = inlined_call_operand.vmem [shape: f32[1,32], index: 17, kind: input, shape index: {}]   ;;  %s7058_s18 = inlined_call_operand.hbm [shape: f32[2,8,32], index: 18, kind: output, shape index: {}]  }
   0x1   :  { %7063 = sst [smem:[#allocation10_spill]] %s7040_s0 }
   0x2   :  { %7064 = sst [smem:[#allocation11_spill]] %s7041_s1 }
   0x3   :  { %7065 = sst [smem:[#allocation12_spill]] %s7042_s2 }
   0x4   :  { %7066 = sst [smem:[#allocation13_spill]] %s7044_s4 }
   0x5   :  { %7067 = sst [smem:[#allocation14_spill]] %s7045_s5 }
   0x6   :  { %7068 = sst [smem:[#allocation15_spill]] %s7046_s6 }
   0x7   :  { %7069 = sst [smem:[#allocation16_spill]] %s7048_s8 }
   0x8   :  { %7070 = sst [smem:[#allocation17_spill]] %s7056_s16 }
   0x9   :  { %7071 = sst [smem:[#allocation18_spill]] %s7057_s17 }
   0xa   :  { %7072 = sst [smem:[#allocation19_spill]] %s7058_s18 }
   0xb   :  { %23 = vsyncpa [#allocation5], 0  ;;  %s6225_s27 = smov 0   ;;  %s6227_s28 = smov 0  }
   0xc   :  { %s6229_s29 = smov 0  }
   0xd LB: > { %7073 = sst [smem:[#allocation7_spill]] %s6110_s28  ;;  %s38_s0 = sadd.s32 1, %s6110_s28  ;;  %s6114_s29 = sphi %s6229_s29, %s29_s29   ;;  %s6110_s28 = sphi %s6227_s28, %s7099_s28   ;;  %s6106_s27 = sphi %s6225_s27, %s7098_s27  }
   0xe   : > { %7074 = sst [smem:[#allocation8_spill]] %s6114_s29  ;;  %p39_p0 = scmp.ge.s32.totalorder %s38_s0, 2 }
   0xf   : > { %p5244_p1 = scmp.ge.s32.totalorder %s6114_s29, 1  ;;  %p659_p2 = scmp.lt.s32.totalorder %s6114_s29, 3 }
  0x10   : > { %s7101_s0 = smov (%p39_p0, %s38_s0), 0 }
  0x11   : > { %7075 = sst [smem:[#allocation9_spill]] %s7101_s0  ;;  %p660_p3 = pnand %p5244_p1, %p659_p2 }
  0x12   : > { %p776_p4 = scmp.lt.s32.totalorder (!%p660_p3), %s6106_s27, 1  ;;  %s7078_s4 = sld [smem:[#allocation13_spill]] (!%p660_p3) }
  0x13   : > { %663 = sbr.rel (%p660_p3) target bundleno = 2942 (0xb7e), region = 92  ;;  %s7079_s6 = sld [smem:[#allocation15_spill]] (!%p660_p3) }
  0x14   : > { %s7080_s8 = sld [smem:[#allocation16_spill]] (!%p660_p3)  ;;  %p5256_p5 = scmp.ne.s32.totalorder (!%p660_p3), %s6106_s27, 0 }
  0x18   : > { %s6248_s19 = scalar_select %p776_p4, %s6106_s27, 1 }
  0x19   : > { %s7081_s22 = sld [smem:[#allocation10_spill]] (!%p5256_p5) }
  0x1a   : > { %s5485_s25 = sshll.u32 %s6248_s19, 4  ;;  %s5488_s5 = sshll.u32 %s6248_s19, 8 }
  0x1b   : > { %s6266_s28 = scalar_lea.vmem %s7078_s4, %s5485_s25  ;;  %s6271_s17 = scalar_lea.vmem %s7079_s6, %s5485_s25 }
  0x1c   : > { %s6280_s16 = scalar_lea.vmem %s7080_s8, %s5485_s25  ;;  %s811_s6 = scalar_lea.vmem %s7051_s11, %s6248_s19 }
  0x1d   : > { %s6298_s2 = scalar_lea.vmem %s7052_s12, %s5488_s5  ;;  %s6303_s8 = scalar_lea.vmem %s7053_s13, %s5485_s25 }
  0x1e   : > { %s5489_s30 = sshll.u32 %s6248_s19, 10  ;;  %s828_s1 = scalar_lea.vmem %s7055_s15, %s6248_s19 }
  0x1f   : > { %s6313_s18 = scalar_lea.vmem %s7054_s14, %s5489_s30  ;;  %834 = sbr.rel (%p5256_p5) target bundleno = 45 (0x2d), region = 96 }
  0x20   : > { %s7082_s23 = sld [smem:[#allocation11_spill]] (!%p5256_p5) }
  0x24   : > { %v835_v0 = vld [vmem:[%s7081_s22] sm:$0xff]  ;;  %vm837_vm0 = vcmask 261120   ;;  %v836_v1 = vld [vmem:[%s7081_s22 + $0x8] sm:$0xff]  ;;  %vm846_vm2 = vcmask 57344   ;;  %v6116_v4 = vmov 0.0  }
  0x25   : > { %838 = vst.msk [vmem:[#allocation2] sm:$0xff] %vm837_vm0, %v835_v0  ;;  %839 = vst.msk [vmem:[#allocation2 + $0x8] sm:$0xff] %vm837_vm0, %v836_v1 }
  0x26   : > { %v840_v2 = vld [vmem:[%s7082_s23] sm:$0x1]  ;;  %v841_v3 = vld [vmem:[%s7082_s23 + $0x1] sm:$0x1] }
  0x27   : > { %vm842_vm1 = vcmp.eq.s32.totalorder %v840_v2, 0  ;;  %vm843_vm3 = vcmp.eq.s32.totalorder %v841_v3, 0 }
  0x28   : > { %v844_v5 = vsel %vm842_vm1, -1e+09, %v6116_v4  ;;  %v845_v6 = vsel %vm843_vm3, -1e+09, %v6116_v4 }
  0x29   : > { %847 = vst.msk [vmem:[#allocation3] sm:$0x1] %vm846_vm2, %v844_v5  ;;  %848 = vst.msk [vmem:[#allocation3 + $0x1] sm:$0x1] %vm846_vm2, %v844_v5 }
  0x2a   : > { %849 = vst.msk [vmem:[#allocation3 + $0x2] sm:$0x1] %vm846_vm2, %v844_v5  ;;  %850 = vst.msk [vmem:[#allocation3 + $0x3] sm:$0x1] %vm846_vm2, %v844_v5 }
  0x2b   : > { %851 = vst.msk [vmem:[#allocation3 + $0x4] sm:$0x1] %vm846_vm2, %v845_v6  ;;  %852 = vst.msk [vmem:[#allocation3 + $0x5] sm:$0x1] %vm846_vm2, %v845_v6 }
  0x2c   : > { %853 = vst.msk [vmem:[#allocation3 + $0x6] sm:$0x1] %vm846_vm2, %v845_v6  ;;  %854 = vst.msk [vmem:[#allocation3 + $0x7] sm:$0x1] %vm846_vm2, %v845_v6 }
  0x2d PF: > { %v855_v7 = vld [vmem:[#allocation2] sm:$0xff]  ;;  %vm859_vm4 = vcmask 261120   ;;  %v856_v8 = vld [vmem:[#allocation2 + $0x8] sm:$0xff]  ;;  %v6117_v23 = vmov 0.0   ;;  %vm6118_vm5 = vmmov 0   ;;  %s7083_s26 = sld [smem:[#allocation12_spill]]  ;;  %s7085_s25 = scalar_lea.vmem %s7043_s3, %s6248_s19  ;;  %v1062_v61 = vlaneseq }
  0x2e   : > { %v860_v9 = vsel %vm859_vm4, %v855_v7, 0.0  ;;  %v863_v10 = vsel %vm859_vm4, %v856_v8, 0.0  ;;  %v5886_v21 = vld [vmem:[%s6266_s28 + $0x8] sm:$0xff]   ;;  %5707 = vmatprep.subr.bf16.mxu0 %v6117_v23  ;;  %5715 = vmatprep.subr.bf16.mxu1 %v6117_v23  ;;  %v5888_v24 = vld [vmem:[%s6266_s28] sm:$0xff]   ;;  %s7086_s0 = sld [smem:[#allocation14_spill]]  ;;  %s7088_s28 = scalar_lea.vmem %s7047_s7, %s6248_s19  ;;  %vm1693_vm6 = vcmask 64512  }
  0x2f   : > { %861 = vadd.xlane.f32.xlu0 %v860_v9  ;;  %v5887_v22 = vld [vmem:[%s6271_s17 + $0x8] sm:$0xff]   ;;  %5708 = vmatpush3.bf16.msra.mxu0 %v5886_v21  ;;  %v5889_v25 = vld [vmem:[%s6271_s17] sm:$0xff]   ;;  %s6121_s5 = smov 104   ;;  %v6122_v59 = vmov 1983009808   ;;  %v6387_v1 = vshrl.u32 %v1062_v61, 7  ;;  %s7090_s17 = scalar_lea.vmem %s7050_s10, %s6248_s19 }
  0x30   : > { %5716 = vmatpush3.bf16.msra.mxu1 %v5887_v22  ;;  %5709 = vmatprep.subr.bf16.mxu0 %v6117_v23  ;;  %v5258_v38 = vld [vmem:[%s7085_s25] ss:$0 sm:$0xff]  ;;  %v1060_v60 = vunpack.c.l.s4 %v6122_v59  ;;  %v6123_v62 = vmov 1934713408   ;;  %vm2161_vm7 = vcmask 1043456   ;;  %s6124_s29 = smov 16  }
  0x31   : > { %5717 = vmatprep.subr.bf16.mxu1 %v6117_v23  ;;  %5711 = vmatprep.mubr.msk.bf16.mxu0 %vm6118_vm5, %v6117_v23  ;;  %v5263_v44 = vld [vmem:[%s7088_s28] ss:$0 sm:$0xff]  ;;  %v1092_v63 = vunpack.c.l.s4 %v6123_v62  ;;  %s6125_s25 = smov 8   ;;  %s6126_s21 = smov 24   ;;  %vm2817_vm8 = vcmask 130048   ;;  %vm2820_vm9 = vcmask 195584  }
  0x32   : > { %5719 = vmatprep.mubr.msk.bf16.mxu1 %vm6118_vm5, %v6117_v23  ;;  %v1061_v0 = vunpack.c.0.s8 %v1060_v60  ;;  %p5478_p6 = scmp.ne.s32.totalorder %s6106_s27, 1 }
  0x33   : > { %864 = vadd.xlane.f32.xlu0 %v863_v10  ;;  %5710 = vmatpush3.bf16.msra.mxu0 %v5888_v24  ;;  %s7084_s20 = scalar_lea.vmem %s7083_s26, %s6248_s19  ;;  %s6119_s26 = smov 112   ;;  %v1093_v4 = vunpack.c.0.s8 %v1092_v63 }
  0x34   : > { %5718 = vmatpush3.bf16.msra.mxu1 %v5889_v25  ;;  %5723 = vmatprep.subr.bf16.mxu0 %v6117_v23  ;;  %v5257_v34 = vld [vmem:[%s7084_s20] ss:$0 sm:$0xff]  ;;  %s7087_s4 = scalar_lea.vmem %s7086_s0, %s6248_s19  ;;  %s6120_s20 = smov 120   ;;  %v6390_v5 = vsub.s32 %v1061_v0, %v6387_v1 }
  0x35   : > { %5729 = vmatprep.subr.bf16.mxu1 %v6117_v23  ;;  %v5259_v43 = vld [vmem:[%s7087_s4] ss:$0 sm:$0xff]  ;;  %s7089_s0 = scalar_lea.vmem %s7049_s9, %s6248_s19 }
  0xb8   : > { %v862_v11 = vpop.xlane.xlu0 %861 }
  0xb9   : > { %v867_v12 = vmul.f32 0.03125, %v862_v11 }
  0xbb   : > { %v869_v13 = vsub.f32 %v855_v7, %v867_v12  ;;  %v6393_v12 = vsub.s32 %v1093_v4, %v6387_v1 }
  0xbc   : > { %v865_v14 = vpop.xlane.xlu0 %864 }
  0xbd   : > { %v868_v15 = vmul.f32 0.03125, %v865_v14  ;;  %v871_v16 = vmul.f32 %v869_v13, %v869_v13 }
  0xbf   : > { %v870_v17 = vsub.f32 %v856_v8, %v868_v15  ;;  %v873_v18 = vsel %vm859_vm4, %v871_v16, 0.0 }
  0xc0   : > { %874 = vadd.xlane.f32.xlu1 %v873_v18 }
  0xc1   : > { %v872_v19 = vmul.f32 %v870_v17, %v870_v17 }
  0xc3   : > { %v876_v20 = vsel %vm859_vm4, %v872_v19, 0.0 }
  0xc4   : > { %877 = vadd.xlane.f32.xlu1 %v876_v20 }
 0x149   : > { %v875_v26 = vpop.xlane.xlu1 %874 }
 0x14a   : > { %v879_v27 = vmul.f32 0.032258064, %v875_v26 }
 0x14c   : > { %6020 = vrsqrt.f32 %v879_v27 }
 0x14d   : > { %v878_v28 = vpop.xlane.xlu1 %877 }
 0x14e   : > { %v880_v29 = vmul.f32 0.032258064, %v878_v28 }
 0x150   : > { %6022 = vrsqrt.f32 %v880_v29 }
 0x159   : > { %v6021_v30 = vpop.eup %6020 }
 0x15a   : > { %v883_v31 = vmul.f32 %v6021_v30, %v869_v13 }
 0x15c   : > { %v885_v32 = vadd.f32 1e-06, %v883_v31 }
 0x15d   : > { %v6023_v33 = vpop.eup %6022 }
 0x15e   : > { %v884_v35 = vmul.f32 %v6023_v33, %v870_v17  ;;  %v893_v37 = vmul.f32 %v5257_v34, %v885_v32 }
 0x160   : > { %v886_v36 = vadd.f32 1e-06, %v884_v35  ;;  %v901_v40 = vadd.f32 %v5258_v38, %v893_v37 }
 0x162   : > { %v894_v39 = vmul.f32 %v5257_v34, %v886_v36 }
 0x164   : > { %v902_v41 = vadd.f32 %v5258_v38, %v894_v39 }
 0x166   : > { %v903_v42 = vpack.c.bf16 %v902_v41, %v901_v40 }
 0x168   : > { %5712 = vmatmul.mubr.msk.bf16.vlgmr.msra.gmra.mxu0 %vm859_vm4, %v903_v42  ;;  %5720 = vmatmul.mubr.msk.bf16.vlgmr.msra.gmra.mxu1 %vm859_vm4, %v903_v42 }
 0x169   : > { %5725 = vmatprep.mubr.msk.bf16.mxu0 %vm6118_vm5, %v6117_v23  ;;  %5731 = vmatprep.mubr.msk.bf16.mxu1 %vm6118_vm5, %v6117_v23 }
 0x228   : > { %v964_v45 = vpop.f32.mrf.mxu0  ;;  %v1028_v46 = vpop.f32.mrf.mxu1 }
 0x229   : > { %v965_v47 = vadd.f32 %v5259_v43, %v964_v45  ;;  %v1029_v48 = vadd.f32 %v5263_v44, %v1028_v46 }
 0x22a   : > { %v5713_v49 = vpop.f32.mrf.mxu0  ;;  %v5721_v50 = vpop.f32.mrf.mxu1 }
 0x22b   : > { %1345 = vrot.lane.b32.xlu1 %v1029_v48, %s6119_s26  ;;  %1339 = vrot.lane.b32.xlu0 %v1029_v48, %s6120_s20  ;;  %v6372_v53 = vmul.f32 0.35355338, %v965_v47 }
 0x22c   : > { %v967_v51 = vpop.f32.mrf.mxu0  ;;  %v1031_v52 = vpop.f32.mrf.mxu1 }
 0x22d   : > { %v6375_v56 = vadd.f32 %v5263_v44, %v1031_v52  ;;  %v968_v57 = vadd.f32 %v5259_v43, %v967_v51 }
 0x22e   : > { %v5714_v54 = vpop.f32.mrf.mxu0  ;;  %v5722_v55 = vpop.f32.mrf.mxu1 }
 0x22f   : > { %1351 = vrot.lane.b32.xlu1 %v1029_v48, %s6121_s5  ;;  %1045 = vrot.lane.b32.xlu0 %v6372_v53, %s6119_s26  ;;  %v6381_v58 = vmul.f32 0.35355338, %v968_v57 }
 0x233   : > { %1341 = vrot.lane.b32.xlu0 %v6375_v56, %s6120_s20  ;;  %1039 = vrot.lane.b32.xlu1 %v6372_v53, %s6120_s20 }
 0x237   : > { %1353 = vrot.lane.b32.xlu0 %v6375_v56, %s6121_s5  ;;  %1051 = vrot.lane.b32.xlu1 %v6372_v53, %s6121_s5 }
 0x23b   : > { %1347 = vrot.lane.b32.xlu1 %v6375_v56, %s6119_s26  ;;  %1047 = vrot.lane.b32.xlu0 %v6381_v58, %s6119_s26 }
 0x23f   : > { %1041 = vrot.lane.b32.xlu1 %v6381_v58, %s6120_s20  ;;  %s7092_s20 = sld [smem:[#allocation18_spill]] (!%p5478_p6) }
 0x243   : > { %1053 = vrot.lane.b32.xlu1 %v6381_v58, %s6121_s5 }
 0x29d   : > { %v1346_v2 = vpop.permute.xlu1 %1345  ;;  %v1340_v3 = vpop.permute.xlu0 %1339 }
 0x29e   : > { %v1357_v6 = vcombine.low %v1029_v48, %v1346_v2  ;;  %v1358_v7 = vcombine.high %v1029_v48, %v1346_v2 }
 0x2a0   : > { %v1365_v13 = vrot.slane %v1357_v6, %v6390_v5  ;;  %v1372_v14 = vrot.slane %v1358_v7, %v6390_v5 }
 0x2a1   : > { %v1352_v8 = vpop.permute.xlu1 %1351  ;;  %v1046_v9 = vpop.permute.xlu0 %1045 }
 0x2a2   : > { %v1373_v10 = vcombine.low %v1340_v3, %v1352_v8  ;;  %v1374_v11 = vcombine.high %v1340_v3, %v1352_v8  ;;  %v1057_v24 = vcombine.low %v6372_v53, %v1046_v9  ;;  %v1058_v25 = vcombine.high %v6372_v53, %v1046_v9 }
 0x2a4   : > { %v1381_v15 = vrot.slane %v1373_v10, %v6390_v5  ;;  %v1388_v16 = vrot.slane %v1374_v11, %v6390_v5  ;;  %v1065_v42 = vrot.slane %v1057_v24, %v6390_v5  ;;  %v1072_v43 = vrot.slane %v1058_v25, %v6390_v5 }
 0x2a5   : > { %v1342_v17 = vpop.permute.xlu0 %1341  ;;  %v1040_v18 = vpop.permute.xlu1 %1039 }
 0x2a6   : > { %v1389_v19 = vcombine.low %v1365_v13, %v1381_v15  ;;  %v1390_v20 = vcombine.high %v1365_v13, %v1381_v15  ;;  %v1405_v21 = vcombine.low %v1372_v14, %v1388_v16  ;;  %v1406_v22 = vcombine.high %v1372_v14, %v1388_v16 }
 0x2a8   : > { %v1397_v26 = vrot.slane %v1389_v19, %v6393_v12  ;;  %v1404_v27 = vrot.slane %v1390_v20, %v6393_v12  ;;  %v1413_v28 = vrot.slane %v1405_v21, %v6393_v12  ;;  %v1420_v29 = vrot.slane %v1406_v22, %v6393_v12 }
 0x2a9   : > { %v1354_v30 = vpop.permute.xlu0 %1353  ;;  %v1052_v31 = vpop.permute.xlu1 %1051 }
 0x2aa   : > { %v1493_v32 = vcombine.low %v1397_v26, %v1404_v27  ;;  %v5271_v33 = vcombine.high %v1397_v26, %v1404_v27  ;;  %v1509_v34 = vcombine.low %v1413_v28, %v1420_v29  ;;  %v5272_v35 = vcombine.high %v1413_v28, %v1420_v29 }
 0x2ab   : > { %v1441_v36 = vcombine.low %v1342_v17, %v1354_v30  ;;  %v1442_v37 = vcombine.high %v1342_v17, %v1354_v30  ;;  %v1073_v38 = vcombine.low %v1040_v18, %v1052_v31  ;;  %v1074_v39 = vcombine.high %v1040_v18, %v1052_v31 }
 0x2ac   : > { %v6406_v40 = vrot.slane %v1493_v32, %v6390_v5  ;;  %v6409_v41 = vrot.slane %v5271_v33, %v6390_v5  ;;  %v6414_v44 = vrot.slane %v1509_v34, %v6390_v5  ;;  %v6417_v45 = vrot.slane %v5272_v35, %v6390_v5 }
 0x2ad   : > { %v1081_v46 = vrot.slane %v1073_v38, %v6390_v5  ;;  %v1088_v47 = vrot.slane %v1074_v39, %v6390_v5  ;;  %v1348_v48 = vpop.permute.xlu1 %1347  ;;  %v1048_v49 = vpop.permute.xlu0 %1047  ;;  %v1449_v50 = vrot.slane %v1441_v36, %v6390_v5  ;;  %v1456_v51 = vrot.slane %v1442_v37, %v6390_v5 }
 0x2ae   : > { %v1425_v52 = vcombine.low %v6375_v56, %v1348_v48  ;;  %v1426_v53 = vcombine.high %v6375_v56, %v1348_v48  ;;  %v1125_v62 = vcombine.low %v6381_v58, %v1048_v49  ;;  %v1126_v63 = vcombine.high %v6381_v58, %v1048_v49 }
 0x2af   : > { %v1089_v54 = vcombine.low %v1065_v42, %v1081_v46  ;;  %v1090_v55 = vcombine.high %v1065_v42, %v1081_v46  ;;  %v1105_v57 = vcombine.low %v1072_v43, %v1088_v47  ;;  %v1106_v59 = vcombine.high %v1072_v43, %v1088_v47 }
 0x2b0   : > { %v1433_v60 = vrot.slane %v1425_v52, %v6390_v5  ;;  %v1440_v61 = vrot.slane %v1426_v53, %v6390_v5  ;;  %v1133_v26 = vrot.slane %v1125_v62, %v6390_v5  ;;  %v1140_v27 = vrot.slane %v1126_v63, %v6390_v5 }
 0x2b1   : > { %v1097_v0 = vrot.slane %v1089_v54, %v6393_v12  ;;  %v1104_v2 = vrot.slane %v1090_v55, %v6393_v12  ;;  %v1113_v3 = vrot.slane %v1105_v57, %v6393_v12  ;;  %v1120_v56 = vrot.slane %v1106_v59, %v6393_v12  ;;  %v1042_v4 = vpop.permute.xlu1 %1041 }
 0x2b2   : > { %v1457_v6 = vcombine.low %v1433_v60, %v1449_v50  ;;  %v1458_v7 = vcombine.high %v1433_v60, %v1449_v50  ;;  %v1473_v8 = vcombine.low %v1440_v61, %v1456_v51  ;;  %v1474_v9 = vcombine.high %v1440_v61, %v1456_v51 }
 0x2b3   : > { %v1193_v10 = vcombine.low %v1097_v0, %v1104_v2  ;;  %v5267_v11 = vcombine.high %v1097_v0, %v1104_v2  ;;  %v1209_v13 = vcombine.low %v1113_v3, %v1120_v56  ;;  %v5268_v14 = vcombine.high %v1113_v3, %v1120_v56 }
 0x2b4   : > { %v1465_v15 = vrot.slane %v1457_v6, %v6393_v12  ;;  %v1472_v58 = vrot.slane %v1458_v7, %v6393_v12  ;;  %v1481_v16 = vrot.slane %v1473_v8, %v6393_v12  ;;  %v1488_v17 = vrot.slane %v1474_v9, %v6393_v12 }
 0x2b5   : > { %v6438_v18 = vrot.slane %v1193_v10, %v6390_v5  ;;  %v6441_v19 = vrot.slane %v5267_v11, %v6390_v5  ;;  %v6444_v20 = vrot.slane %v1209_v13, %v6390_v5  ;;  %v6447_v21 = vrot.slane %v5268_v14, %v6390_v5  ;;  %v1054_v25 = vpop.permute.xlu1 %1053 }
 0x2b6   : > { %v1561_v22 = vcombine.low %v1465_v15, %v1472_v58  ;;  %v5273_v24 = vcombine.high %v1465_v15, %v1472_v58  ;;  %v1577_v30 = vcombine.low %v1481_v16, %v1488_v17  ;;  %v5274_v31 = vcombine.high %v1481_v16, %v1488_v17 }
 0x2b7   : > { %v1225_v28 = vcombine.low %v6438_v18, %v6441_v19  ;;  %v1241_v29 = vcombine.low %v6444_v20, %v6447_v21  ;;  %v1141_v32 = vcombine.low %v1042_v4, %v1054_v25  ;;  %v1142_v33 = vcombine.high %v1042_v4, %v1054_v25 }
 0x2b8   : > { %v1525_v34 = vcombine.low %v6406_v40, %v6409_v41  ;;  %v1541_v35 = vcombine.low %v6414_v44, %v6417_v45  ;;  %v1568_v36 = vrot.slane %v1561_v22, %v6390_v5  ;;  %v1576_v37 = vrot.slane %v5273_v24, %v6390_v5 }
 0x2b9   : > { %v1526_v38 = vcombine.high %v6406_v40, %v6409_v41  ;;  %v1542_v39 = vcombine.high %v6414_v44, %v6417_v45  ;;  %v1149_v42 = vrot.slane %v1141_v32, %v6390_v5  ;;  %v1156_v43 = vrot.slane %v1142_v33, %v6390_v5 }
 0x2ba   : > { %v1533_v46 = vrot.slane %v1525_v34, %v6393_v12  ;;  %v1549_v47 = vrot.slane %v1541_v35, %v6393_v12  ;;  %v1233_v48 = vrot.slane %v1225_v28, %v6393_v12  ;;  %v1249_v49 = vrot.slane %v1241_v29, %v6393_v12 }
 0x2bb   : > { %v1540_v50 = vrot.slane %v1526_v38, %v6393_v12  ;;  %v1556_v51 = vrot.slane %v1542_v39, %v6393_v12  ;;  %v1157_v40 = vcombine.low %v1133_v26, %v1149_v42  ;;  %v1158_v41 = vcombine.high %v1133_v26, %v1149_v42 }
 0x2bc   : > { %v1173_v52 = vcombine.low %v1140_v27, %v1156_v43  ;;  %v1174_v44 = vcombine.high %v1140_v27, %v1156_v43  ;;  %v1584_v45 = vrot.slane %v1577_v30, %v6390_v5  ;;  %v1592_v53 = vrot.slane %v5274_v31, %v6390_v5 }
 0x2bd   : > { %v1557_v54 = vcombine.low %v1533_v46, %v1549_v47  ;;  %v1558_v55 = vcombine.high %v1533_v46, %v1549_v47  ;;  %v1165_v57 = vrot.slane %v1157_v40, %v6393_v12  ;;  %v1172_v59 = vrot.slane %v1158_v41, %v6393_v12 }
 0x2be   : > { %v1181_v60 = vrot.slane %v1173_v52, %v6393_v12  ;;  %v1188_v61 = vrot.slane %v1174_v44, %v6393_v12  ;;  %v1257_v0 = vcombine.low %v1233_v48, %v1249_v49  ;;  %v1258_v2 = vcombine.high %v1233_v48, %v1249_v49 }
 0x2bf   : > { %v6479_v62 = vpack.c.bf16 %v1557_v54, %v1557_v54  ;;  %v6481_v63 = vpack.c.bf16 %v1558_v55, %v1558_v55  ;;  %v1261_v3 = vcombine.low %v1165_v57, %v1172_v59  ;;  %v5269_v56 = vcombine.high %v1165_v57, %v1172_v59 }
 0x2c0   : > { %v1559_v4 = vcombine.low %v1540_v50, %v1556_v51  ;;  %v1560_v6 = vcombine.high %v1540_v50, %v1556_v51  ;;  %v1277_v7 = vcombine.low %v1181_v60, %v1188_v61  ;;  %v5270_v8 = vcombine.high %v1181_v60, %v1188_v61 }
 0x2c1   : > { %v1698_v9 = vsel %vm1693_vm6, %v6479_v62, 0  ;;  %v1744_v10 = vsel %vm1693_vm6, %v6481_v63, 0  ;;  %v1226_v11 = vcombine.high %v6438_v18, %v6441_v19  ;;  %v1242_v13 = vcombine.high %v6444_v20, %v6447_v21 }
 0x2c2   : > { %5724 = vmatpush3.bf16.xpose.msra.mxu0 %v1698_v9  ;;  %5730 = vmatpush3.bf16.xpose.msra.mxu1 %v1744_v10  ;;  %v1329_v14 = vpack.c.bf16 %v1257_v0, %v1257_v0  ;;  %v1330_v15 = vpack.c.bf16 %v1258_v2, %v1258_v2  ;;  %v6493_v58 = vrot.slane %v1261_v3, %v6390_v5 }
 0x2c3   : > { %5735 = vmatprep.subr.bf16.mxu0 %v6117_v23  ;;  %v6496_v16 = vrot.slane %v5269_v56, %v6390_v5  ;;  %5741 = vmatprep.subr.bf16.mxu1 %v6117_v23  ;;  %v1631_v17 = vpack.c.bf16 %v1559_v4, %v1559_v4  ;;  %v1632_v22 = vpack.c.bf16 %v1560_v6, %v1560_v6 }
 0x2c4   : > { %v1284_v18 = vrot.slane %v1277_v7, %v6390_v5  ;;  %v1292_v19 = vrot.slane %v5270_v8, %v6390_v5  ;;  %v1593_v20 = vcombine.low %v1568_v36, %v1576_v37  ;;  %v1609_v21 = vcombine.low %v1584_v45, %v1592_v53 }
 0x2c5   : > { %v1240_v24 = vrot.slane %v1226_v11, %v6393_v12  ;;  %v1256_v25 = vrot.slane %v1242_v13, %v6393_v12  ;;  %v1594_v26 = vcombine.high %v1568_v36, %v1576_v37  ;;  %v1610_v27 = vcombine.high %v1584_v45, %v1592_v53 }
 0x2c6   : > { %v1601_v28 = vrot.slane %v1593_v20, %v6393_v12  ;;  %v1617_v29 = vrot.slane %v1609_v21, %v6393_v12  ;;  %v1293_v32 = vcombine.low %v6493_v58, %v6496_v16  ;;  %v1790_v33 = vsel %vm1693_vm6, %v1631_v17, 0 }
 0x2c7   : > { %v1608_v30 = vrot.slane %v1594_v26, %v6393_v12  ;;  %v1624_v31 = vrot.slane %v1610_v27, %v6393_v12  ;;  %v1309_v36 = vcombine.low %v1284_v18, %v1292_v19  ;;  %v1836_v37 = vsel %vm1693_vm6, %v1632_v22, 0  ;;  %v5277_v27 = vld [vmem:[#allocation3 + $0x2] ss:$0 sm:$0xff] }
 0x2c8   : > { %v1625_v34 = vcombine.low %v1601_v28, %v1617_v29  ;;  %v1626_v35 = vcombine.high %v1601_v28, %v1617_v29  ;;  %v1259_v38 = vcombine.low %v1240_v24, %v1256_v25  ;;  %v1260_v47 = vcombine.high %v1240_v24, %v1256_v25 }
 0x2c9   : > { %5726 = vmatmul.mubr.msk.bf16.vlgmr.msra.gmra.mxu0 %vm1693_vm6, %v1329_v14  ;;  %5732 = vmatmul.mubr.msk.bf16.vlgmr.msra.gmra.mxu1 %vm1693_vm6, %v1330_v15  ;;  %v1627_v39 = vcombine.low %v1608_v30, %v1624_v31  ;;  %v1628_v46 = vcombine.high %v1608_v30, %v1624_v31  ;;  %v6519_v49 = vsel %vm2161_vm7, %v1631_v17, 0  ;;  %v6523_v51 = vsel %vm2161_vm7, %v1632_v22, 0  ;;  %v5278_v30 = vld [vmem:[#allocation3 + $0x3] ss:$0 sm:$0xff] }
 0x2ca   : > { %5736 = vmatpush3.bf16.xpose.msra.mxu0 %v1790_v33  ;;  %5742 = vmatpush3.bf16.xpose.msra.mxu1 %v1836_v37  ;;  %v1633_v42 = vpack.c.bf16 %v1625_v34, %v1625_v34  ;;  %v1634_v43 = vpack.c.bf16 %v1626_v35, %v1626_v35  ;;  %v1301_v40 = vrot.slane %v1293_v32, %v6393_v12  ;;  %v2162_v14 = vsel %vm2161_vm7, %v6479_v62, 0 }
 0x2cb   : > { %5737 = vmatprep.mubr.msk.bf16.mxu0 %vm6118_vm5, %v6117_v23  ;;  %5743 = vmatprep.mubr.msk.bf16.mxu1 %vm6118_vm5, %v6117_v23  ;;  %v1635_v48 = vpack.c.bf16 %v1627_v39, %v1627_v39  ;;  %v1636_v50 = vpack.c.bf16 %v1628_v46, %v1628_v46  ;;  %v1317_v41 = vrot.slane %v1309_v36, %v6393_v12  ;;  %v2207_v15 = vsel %vm2161_vm7, %v6481_v63, 0  ;;  %v5280_v46 = vld [vmem:[#allocation3 + $0x5] ss:$0 sm:$0xff] }
 0x2cc   : > { %5747 = vmatprep.subr.bf16.mxu0 %v6117_v23  ;;  %5753 = vmatprep.subr.bf16.mxu1 %v6117_v23  ;;  %v6528_v52 = vsel %vm2161_vm7, %v1633_v42, 0  ;;  %v1331_v44 = vpack.c.bf16 %v1259_v38, %v1259_v38  ;;  %v6531_v45 = vsel %vm2161_vm7, %v1634_v43, 0  ;;  %v1332_v55 = vpack.c.bf16 %v1260_v47, %v1260_v47 }
 0x2cd   : > { %v6534_v53 = vsel %vm2161_vm7, %v1635_v48, 0  ;;  %v6537_v54 = vsel %vm2161_vm7, %v1636_v50, 0  ;;  %v1882_v57 = vsel %vm1693_vm6, %v1633_v42, 0  ;;  %v1928_v59 = vsel %vm1693_vm6, %v1634_v43, 0  ;;  %v5279_v42 = vld [vmem:[#allocation3 + $0x4] ss:$0 sm:$0xff] }
 0x2ce   : > { %v1294_v60 = vcombine.high %v6493_v58, %v6496_v16  ;;  %v1310_v61 = vcombine.high %v1284_v18, %v1292_v19  ;;  %v1325_v0 = vcombine.low %v1301_v40, %v1317_v41  ;;  %v1326_v2 = vcombine.high %v1301_v40, %v1317_v41  ;;  %v5275_v58 = vld [vmem:[#allocation3] ss:$0 sm:$0xff]  ;;  %v5276_v16 = vld [vmem:[#allocation3 + $0x1] ss:$0 sm:$0xff] }
 0x2cf   : > { %v1974_v7 = vsel %vm1693_vm6, %v1635_v48, 0  ;;  %v2020_v8 = vsel %vm1693_vm6, %v1636_v50, 0 }
 0x2d0   : > { %v1333_v3 = vpack.c.bf16 %v1325_v0, %v1325_v0  ;;  %v1308_v56 = vrot.slane %v1294_v60, %v6393_v12  ;;  %v1324_v4 = vrot.slane %v1310_v61, %v6393_v12  ;;  %v1334_v6 = vpack.c.bf16 %v1326_v2, %v1326_v2  ;;  %v5281_v2 = vld [vmem:[#allocation3 + $0x6] ss:$0 sm:$0xff] }
 0x2d1   : > { %5738 = vmatmul.mubr.msk.bf16.vlgmr.msra.gmra.mxu0 %vm1693_vm6, %v1331_v44  ;;  %5744 = vmatmul.mubr.msk.bf16.vlgmr.msra.gmra.mxu1 %vm1693_vm6, %v1332_v55 }
 0x2d2   : > { %5748 = vmatpush3.bf16.xpose.msra.mxu0 %v1882_v57  ;;  %5754 = vmatpush3.bf16.xpose.msra.mxu1 %v1928_v59  ;;  %v1327_v9 = vcombine.low %v1308_v56, %v1324_v4  ;;  %v1328_v10 = vcombine.high %v1308_v56, %v1324_v4  ;;  %v5282_v56 = vld [vmem:[#allocation3 + $0x7] ss:$0 sm:$0xff] }
 0x2d3   : > { %5749 = vmatprep.mubr.msk.bf16.mxu0 %vm6118_vm5, %v6117_v23  ;;  %5755 = vmatprep.mubr.msk.bf16.mxu1 %vm6118_vm5, %v6117_v23 }
 0x2d4   : > { %5759 = vmatprep.subr.bf16.mxu0 %v6117_v23  ;;  %5765 = vmatprep.subr.bf16.mxu1 %v6117_v23  ;;  %v1335_v11 = vpack.c.bf16 %v1327_v9, %v1327_v9  ;;  %v1336_v13 = vpack.c.bf16 %v1328_v10, %v1328_v10 }
 0x2d9   : > { %5750 = vmatmul.mubr.msk.bf16.vlgmr.msra.gmra.mxu0 %vm1693_vm6, %v1333_v3  ;;  %5756 = vmatmul.mubr.msk.bf16.vlgmr.msra.gmra.mxu1 %vm1693_vm6, %v1334_v6 }
 0x2da   : > { %5760 = vmatpush3.bf16.xpose.msra.mxu0 %v1974_v7  ;;  %5766 = vmatpush3.bf16.xpose.msra.mxu1 %v2020_v8 }
 0x2db   : > { %5761 = vmatprep.mubr.msk.bf16.mxu0 %vm6118_vm5, %v6117_v23  ;;  %5767 = vmatprep.mubr.msk.bf16.mxu1 %vm6118_vm5, %v6117_v23 }
 0x2dc   : > { %5771 = vmatprep.subr.bf16.mxu0 %v6117_v23  ;;  %5777 = vmatprep.subr.bf16.mxu1 %v6117_v23 }
 0x2e1   : > { %5762 = vmatmul.mubr.msk.bf16.vlgmr.msra.gmra.mxu0 %vm1693_vm6, %v1335_v11  ;;  %5768 = vmatmul.mubr.msk.bf16.vlgmr.msra.gmra.mxu1 %vm1693_vm6, %v1336_v13 }
 0x2e2   : > { %5772 = vmatpush3.bf16.msra.mxu0 %v2162_v14  ;;  %5778 = vmatpush3.bf16.msra.mxu1 %v2207_v15 }
 0x2e3   : > { %5773 = vmatprep.mubr.msk.bf16.mxu0 %vm6118_vm5, %v6117_v23  ;;  %5779 = vmatprep.mubr.msk.bf16.mxu1 %vm6118_vm5, %v6117_v23 }
 0x2e4   : > { %5783 = vmatprep.subr.bf16.mxu0 %v6117_v23  ;;  %5789 = vmatprep.subr.bf16.mxu1 %v6117_v23 }
 0x389   : > { %v1734_v62 = vpop.f32.mrf.mxu0  ;;  %v1780_v22 = vpop.f32.mrf.mxu1 }
 0x38a   : > { %v6575_v17 = vadd.f32 %v5275_v58, %v1734_v62  ;;  %v6577_v18 = vadd.f32 %v5276_v16, %v1780_v22 }
 0x38b   : > { %v5727_v63 = vpop.f32.mrf.mxu0  ;;  %v5733_v19 = vpop.f32.mrf.mxu1 }
 0x38c   : > { %v2062_v20 = vsel %vm1693_vm6, %v6575_v17, -inf  ;;  %v2065_v21 = vsel %vm1693_vm6, %v6577_v18, -inf }
 0x38d   : > { %2063 = vmax.xlane.f32.xlu0 %v2062_v20  ;;  %v1737_v24 = vpop.f32.mrf.mxu0  ;;  %v1783_v25 = vpop.f32.mrf.mxu1  ;;  %2066 = vmax.xlane.f32.xlu1 %v2065_v21 }
 0x38f   : > { %v5728_v26 = vpop.f32.mrf.mxu0  ;;  %v5734_v28 = vpop.f32.mrf.mxu1 }
 0x391   : > { %v1826_v29 = vpop.f32.mrf.mxu0  ;;  %v1872_v32 = vpop.f32.mrf.mxu1 }
 0x392   : > { %v1827_v31 = vadd.f32 %v5277_v27, %v1826_v29  ;;  %v1873_v34 = vadd.f32 %v5278_v30, %v1872_v32 }
 0x393   : > { %v5739_v33 = vpop.f32.mrf.mxu0  ;;  %v5745_v35 = vpop.f32.mrf.mxu1 }
 0x394   : > { %v2068_v36 = vsel %vm1693_vm6, %v1827_v31, -inf  ;;  %v2071_v47 = vsel %vm1693_vm6, %v1873_v34, -inf }
 0x395   : > { %2069 = vmax.xlane.f32.xlu0 %v2068_v36  ;;  %v1829_v37 = vpop.f32.mrf.mxu0  ;;  %v1875_v38 = vpop.f32.mrf.mxu1 }
 0x397   : > { %v5740_v39 = vpop.f32.mrf.mxu0  ;;  %v5746_v43 = vpop.f32.mrf.mxu1 }
 0x399   : > { %2072 = vmax.xlane.f32.xlu0 %v2071_v47  ;;  %v1918_v48 = vpop.f32.mrf.mxu0  ;;  %v1964_v50 = vpop.f32.mrf.mxu1 }
 0x39a   : > { %v1919_v40 = vadd.f32 %v5279_v42, %v1918_v48  ;;  %v1965_v41 = vadd.f32 %v5280_v46, %v1964_v50 }
 0x39b   : > { %v5751_v44 = vpop.f32.mrf.mxu0  ;;  %v5757_v55 = vpop.f32.mrf.mxu1 }
 0x39c   : > { %v2074_v57 = vsel %vm1693_vm6, %v1919_v40, -inf  ;;  %v2077_v59 = vsel %vm1693_vm6, %v1965_v41, -inf }
 0x39d   : > { %2075 = vmax.xlane.f32.xlu0 %v2074_v57  ;;  %v1921_v60 = vpop.f32.mrf.mxu0  ;;  %2078 = vmax.xlane.f32.xlu1 %v2077_v59  ;;  %v1967_v61 = vpop.f32.mrf.mxu1 }
 0x39f   : > { %v5752_v0 = vpop.f32.mrf.mxu0  ;;  %v5758_v3 = vpop.f32.mrf.mxu1 }
 0x3a1   : > { %v2010_v4 = vpop.f32.mrf.mxu0  ;;  %v2056_v7 = vpop.f32.mrf.mxu1 }
 0x3a2   : > { %v2011_v6 = vadd.f32 %v5281_v2, %v2010_v4  ;;  %v2057_v8 = vadd.f32 %v5282_v56, %v2056_v7 }
 0x3a3   : > { %v5763_v9 = vpop.f32.mrf.mxu0  ;;  %v5769_v10 = vpop.f32.mrf.mxu1 }
 0x3a4   : > { %v2080_v11 = vsel %vm1693_vm6, %v2011_v6, -inf  ;;  %v2083_v13 = vsel %vm1693_vm6, %v2057_v8, -inf }
 0x3a5   : > { %2081 = vmax.xlane.f32.xlu0 %v2080_v11  ;;  %v2013_v14 = vpop.f32.mrf.mxu0  ;;  %2084 = vmax.xlane.f32.xlu1 %v2083_v13  ;;  %v2059_v15 = vpop.f32.mrf.mxu1 }
 0x3a7   : > { %v5764_v58 = vpop.f32.mrf.mxu0  ;;  %v5770_v16 = vpop.f32.mrf.mxu1 }
 0x416   : > { %v2064_v62 = vpop.xlane.xlu0 %2063  ;;  %v2067_v22 = vpop.xlane.xlu1 %2066 }
 0x417   : > { %v2086_v63 = vsub.f32 %v6575_v17, %v2064_v62  ;;  %v2087_v19 = vsub.f32 %v6577_v18, %v2067_v22 }
 0x419   : > { %v2094_v20 = vmul.f32 1.442695, %v2086_v63  ;;  %v2096_v21 = vmul.f32 1.442695, %v2087_v19 }
 0x41b   : > { %6024 = vpow2.f32 %v2094_v20 }
 0x41c   : > { %6026 = vpow2.f32 %v2096_v21 }
 0x41e   : > { %v2070_v24 = vpop.xlane.xlu0 %2069 }
 0x41f   : > { %v2088_v25 = vsub.f32 %v1827_v31, %v2070_v24 }
 0x421   : > { %v2098_v26 = vmul.f32 1.442695, %v2088_v25 }
 0x422   : > { %v2073_v27 = vpop.xlane.xlu0 %2072 }
 0x423   : > { %6028 = vpow2.f32 %v2098_v26  ;;  %v2089_v28 = vsub.f32 %v1873_v34, %v2073_v27 }
 0x425   : > { %v2100_v29 = vmul.f32 1.442695, %v2089_v28 }
 0x426   : > { %v2076_v30 = vpop.xlane.xlu0 %2075  ;;  %v2079_v32 = vpop.xlane.xlu1 %2078 }
 0x427   : > { %6030 = vpow2.f32 %v2100_v29  ;;  %v2090_v33 = vsub.f32 %v1919_v40, %v2076_v30  ;;  %v2091_v36 = vsub.f32 %v1965_v41, %v2079_v32 }
 0x428   : > { %v6025_v35 = vpop.eup %6024 }
 0x429   : > { %v6027_v17 = vpop.eup %6026  ;;  %v2102_v37 = vmul.f32 1.442695, %v2090_v33  ;;  %v2110_v18 = vsel %vm1693_vm6, %v6025_v35, 0.0  ;;  %v2104_v38 = vmul.f32 1.442695, %v2091_v36 }
 0x42a   : > { %v2113_v39 = vsel %vm1693_vm6, %v6027_v17, 0.0  ;;  %2111 = vadd.xlane.f32.xlu0 %v2110_v18 }
 0x42b   : > { %6032 = vpow2.f32 %v2102_v37  ;;  %2114 = vadd.xlane.f32.xlu1 %v2113_v39 }
 0x42c   : > { %6034 = vpow2.f32 %v2104_v38 }
 0x42e   : > { %v2082_v31 = vpop.xlane.xlu0 %2081  ;;  %v2085_v34 = vpop.xlane.xlu1 %2084 }
 0x42f   : > { %v2092_v42 = vsub.f32 %v2011_v6, %v2082_v31  ;;  %v2093_v46 = vsub.f32 %v2057_v8, %v2085_v34 }
 0x430   : > { %v6029_v43 = vpop.eup %6028 }
 0x431   : > { %v2106_v47 = vmul.f32 1.442695, %v2092_v42  ;;  %v2116_v48 = vsel %vm1693_vm6, %v6029_v43, 0.0  ;;  %v2108_v50 = vmul.f32 1.442695, %v2093_v46 }
 0x432   : > { %2117 = vadd.xlane.f32.xlu0 %v2116_v48 }
 0x433   : > { %6036 = vpow2.f32 %v2106_v47 }
 0x434   : > { %v6031_v40 = vpop.eup %6030  ;;  %6038 = vpow2.f32 %v2108_v50 }
 0x435   : > { %v2119_v41 = vsel %vm1693_vm6, %v6031_v40, 0.0 }
 0x436   : > { %2120 = vadd.xlane.f32.xlu1 %v2119_v41 }
 0x438   : > { %v6033_v44 = vpop.eup %6032 }
 0x439   : > { %v6035_v55 = vpop.eup %6034  ;;  %v2122_v57 = vsel %vm1693_vm6, %v6033_v44, 0.0 }
 0x43a   : > { %v2125_v59 = vsel %vm1693_vm6, %v6035_v55, 0.0  ;;  %2123 = vadd.xlane.f32.xlu0 %v2122_v57 }
 0x43b   : > { %2126 = vadd.xlane.f32.xlu1 %v2125_v59 }
 0x440   : > { %v6597_v60 = vpop.eup %6036 }
 0x441   : > { %v6599_v61 = vpop.eup %6038  ;;  %v2128_v0 = vsel %vm1693_vm6, %v6597_v60, 0.0 }
 0x442   : > { %v2131_v2 = vsel %vm1693_vm6, %v6599_v61, 0.0  ;;  %2129 = vadd.xlane.f32.xlu0 %v2128_v0 }
 0x443   : > { %2132 = vadd.xlane.f32.xlu1 %v2131_v2 }
 0x4b3   : > { %v2112_v3 = vpop.xlane.xlu0 %2111 }
 0x4b4   : > { %v2115_v56 = vpop.xlane.xlu1 %2114  ;;  %6040 = vrcp.f32 %v2112_v3 }
 0x4b5   : > { %6042 = vrcp.f32 %v2115_v56 }
 0x4bb   : > { %v2118_v4 = vpop.xlane.xlu0 %2117 }
 0x4bc   : > { %6044 = vrcp.f32 %v2118_v4 }
 0x4bf   : > { %v2121_v6 = vpop.xlane.xlu1 %2120 }
 0x4c0   : > { %6046 = vrcp.f32 %v2121_v6 }
 0x4c1   : > { %v6041_v7 = vpop.eup %6040 }
 0x4c2   : > { %v6043_v8 = vpop.eup %6042  ;;  %v2142_v9 = vmul.f32 %v6041_v7, %v6025_v35 }
 0x4c3   : > { %v2124_v10 = vpop.xlane.xlu0 %2123  ;;  %v2143_v11 = vmul.f32 %v6043_v8, %v6027_v17 }
 0x4c4   : > { %v2127_v13 = vpop.xlane.xlu1 %2126  ;;  %6048 = vrcp.f32 %v2124_v10  ;;  %v2150_v14 = vpack.c.bf16 %v2142_v9, %v2142_v9 }
 0x4c5   : > { %6050 = vrcp.f32 %v2127_v13  ;;  %v2151_v15 = vpack.c.bf16 %v2143_v11, %v2143_v11 }
 0x4c6   : > { %5774 = vmatmul.mubr.msk.bf16.vlgmr.msra.gmra.mxu0 %vm1693_vm6, %v2150_v14 }
 0x4c7   : > { %5780 = vmatmul.mubr.msk.bf16.vlgmr.msra.gmra.mxu1 %vm1693_vm6, %v2151_v15  ;;  %5784 = vmatpush3.bf16.msra.mxu0 %v6519_v49 }
 0x4c8   : > { %5790 = vmatpush3.bf16.msra.mxu1 %v6523_v51  ;;  %5785 = vmatprep.mubr.msk.bf16.mxu0 %vm6118_vm5, %v6117_v23 }
 0x4c9   : > { %v6045_v58 = vpop.eup %6044  ;;  %5795 = vmatprep.subr.bf16.mxu0 %v6117_v23  ;;  %5791 = vmatprep.mubr.msk.bf16.mxu1 %vm6118_vm5, %v6117_v23 }
 0x4ca   : > { %v2144_v16 = vmul.f32 %v6045_v58, %v6029_v43  ;;  %5801 = vmatprep.subr.bf16.mxu1 %v6117_v23 }
 0x4cb   : > { %v2130_v62 = vpop.xlane.xlu0 %2129 }
 0x4cc   : > { %v2133_v22 = vpop.xlane.xlu1 %2132  ;;  %6052 = vrcp.f32 %v2130_v62  ;;  %v2152_v63 = vpack.c.bf16 %v2144_v16, %v2144_v16 }
 0x4cd   : > { %v6047_v19 = vpop.eup %6046  ;;  %6054 = vrcp.f32 %v2133_v22 }
 0x4ce   : > { %5786 = vmatmul.mubr.msk.bf16.vlgmr.msra.gmra.mxu0 %vm1693_vm6, %v2152_v63  ;;  %v2145_v49 = vmul.f32 %v6047_v19, %v6031_v40 }
 0x4cf   : > { %5796 = vmatpush3.bf16.msra.mxu0 %v6528_v52  ;;  %5797 = vmatprep.mubr.msk.bf16.mxu0 %vm6118_vm5, %v6117_v23 }
 0x4d0   : > { %v2153_v51 = vpack.c.bf16 %v2145_v49, %v2145_v49  ;;  %5807 = vmatprep.subr.bf16.mxu0 %v6117_v23 }
 0x4d1   : > { %v6049_v20 = vpop.eup %6048 }
 0x4d2   : > { %v6051_v21 = vpop.eup %6050  ;;  %5792 = vmatmul.mubr.msk.bf16.vlgmr.msra.gmra.mxu1 %vm1693_vm6, %v2153_v51  ;;  %v2146_v24 = vmul.f32 %v6049_v20, %v6033_v44 }
 0x4d3   : > { %5802 = vmatpush3.bf16.msra.mxu1 %v6531_v45  ;;  %5803 = vmatprep.mubr.msk.bf16.mxu1 %vm6118_vm5, %v6117_v23  ;;  %v2147_v52 = vmul.f32 %v6051_v21, %v6035_v55 }
 0x4d4   : > { %v2154_v25 = vpack.c.bf16 %v2146_v24, %v2146_v24  ;;  %5813 = vmatprep.subr.bf16.mxu1 %v6117_v23 }
 0x4d5   : > { %v2155_v26 = vpack.c.bf16 %v2147_v52, %v2147_v52 }
 0x4d6   : > { %5798 = vmatmul.mubr.msk.bf16.vlgmr.msra.gmra.mxu0 %vm1693_vm6, %v2154_v25 }
 0x4d7   : > { %5808 = vmatpush3.bf16.msra.mxu0 %v6534_v53  ;;  %5809 = vmatprep.mubr.msk.bf16.mxu0 %vm6118_vm5, %v6117_v23 }
 0x4d8   : > { %5819 = vmatprep.subr.bf16.mxu0 %v6117_v23 }
 0x4d9   : > { %v6053_v27 = vpop.eup %6052 }
 0x4da   : > { %v6055_v28 = vpop.eup %6054  ;;  %5804 = vmatmul.mubr.msk.bf16.vlgmr.msra.gmra.mxu1 %vm1693_vm6, %v2155_v26  ;;  %v2148_v45 = vmul.f32 %v6053_v27, %v6597_v60 }
 0x4db   : > { %5814 = vmatpush3.bf16.msra.mxu1 %v6537_v54  ;;  %5815 = vmatprep.mubr.msk.bf16.mxu1 %vm6118_vm5, %v6117_v23  ;;  %v2149_v53 = vmul.f32 %v6055_v28, %v6599_v61 }
 0x4dc   : > { %v2156_v29 = vpack.c.bf16 %v2148_v45, %v2148_v45 }
 0x4dd   : > { %v2157_v30 = vpack.c.bf16 %v2149_v53, %v2149_v53 }
 0x4de   : > { %5810 = vmatmul.mubr.msk.bf16.vlgmr.msra.gmra.mxu0 %vm1693_vm6, %v2156_v29 }
 0x4df   : > { %5823 = vmatprep.mubr.msk.bf16.mxu0 %vm6118_vm5, %v6117_v23 }
 0x4e2   : > { %5816 = vmatmul.mubr.msk.bf16.vlgmr.msra.gmra.mxu1 %vm1693_vm6, %v2157_v30 }
 0x586   : > { %v2198_v32 = vpop.f32.mrf.mxu0 }
 0x587   : > { %v2243_v33 = vpop.f32.mrf.mxu1 }
 0x588   : > { %v5775_v35 = vpop.f32.mrf.mxu0 }
 0x589   : > { %v5781_v36 = vpop.f32.mrf.mxu1 }
 0x58a   : > { %v2201_v17 = vpop.f32.mrf.mxu0 }
 0x58b   : > { %v2246_v54 = vpop.f32.mrf.mxu1 }
 0x58c   : > { %v5776_v37 = vpop.f32.mrf.mxu0 }
 0x58d   : > { %v5782_v18 = vpop.f32.mrf.mxu1 }
 0x58e   : > { %v2288_v38 = vpop.f32.mrf.mxu0 }
 0x58f   : > { %v2519_v31 = vcombine.low %v2198_v32, %v2288_v38  ;;  %v2520_v34 = vcombine.high %v2198_v32, %v2288_v38 }
 0x590   : > { %v5787_v39 = vpop.f32.mrf.mxu0 }
 0x591   : > { %v2527_v40 = vrot.slane %v2519_v31, %v6390_v5  ;;  %v2534_v41 = vrot.slane %v2520_v34, %v6390_v5 }
 0x592   : > { %v2291_v42 = vpop.f32.mrf.mxu0  ;;  %v2333_v43 = vpop.f32.mrf.mxu1 }
 0x593   : > { %v2535_v46 = vcombine.low %v2243_v33, %v2333_v43  ;;  %v2536_v47 = vcombine.high %v2243_v33, %v2333_v43 }
 0x594   : > { %v5788_v48 = vpop.f32.mrf.mxu0  ;;  %v5793_v50 = vpop.f32.mrf.mxu1 }
 0x595   : > { %v2543_v44 = vrot.slane %v2535_v46, %v6390_v5  ;;  %v2550_v55 = vrot.slane %v2536_v47, %v6390_v5 }
 0x596   : > { %v2336_v57 = vpop.f32.mrf.mxu1  ;;  %v2378_v59 = vpop.f32.mrf.mxu0 }
 0x597   : > { %v2551_v60 = vcombine.low %v2527_v40, %v2543_v44  ;;  %v2552_v61 = vcombine.high %v2527_v40, %v2543_v44  ;;  %v2567_v0 = vcombine.low %v2534_v41, %v2550_v55  ;;  %v2568_v2 = vcombine.high %v2534_v41, %v2550_v55 }
 0x598   : > { %v5794_v3 = vpop.f32.mrf.mxu1  ;;  %v5799_v56 = vpop.f32.mrf.mxu0 }
 0x599   : > { %v2559_v4 = vrot.slane %v2551_v60, %v6393_v12  ;;  %v2566_v6 = vrot.slane %v2552_v61, %v6393_v12  ;;  %v2575_v7 = vrot.slane %v2567_v0, %v6393_v12  ;;  %v2582_v8 = vrot.slane %v2568_v2, %v6393_v12 }
 0x59a   : > { %v2381_v9 = vpop.f32.mrf.mxu0  ;;  %v2423_v10 = vpop.f32.mrf.mxu1 }
 0x59b   : > { %v2655_v11 = vcombine.low %v2559_v4, %v2566_v6  ;;  %v5299_v13 = vcombine.high %v2559_v4, %v2566_v6  ;;  %v2671_v14 = vcombine.low %v2575_v7, %v2582_v8  ;;  %v5300_v15 = vcombine.high %v2575_v7, %v2582_v8 }
 0x59c   : > { %v5800_v58 = vpop.f32.mrf.mxu0  ;;  %v5805_v16 = vpop.f32.mrf.mxu1 }
 0x59d   : > { %v2662_v62 = vrot.slane %v2655_v11, %v6390_v5  ;;  %v2670_v22 = vrot.slane %v5299_v13, %v6390_v5  ;;  %v2678_v63 = vrot.slane %v2671_v14, %v6390_v5  ;;  %v2686_v19 = vrot.slane %v5300_v15, %v6390_v5 }
 0x59e   : > { %v2426_v49 = vpop.f32.mrf.mxu1  ;;  %v2468_v51 = vpop.f32.mrf.mxu0 }
 0x59f   : > { %v2687_v24 = vcombine.low %v2662_v62, %v2670_v22  ;;  %v2703_v25 = vcombine.low %v2678_v63, %v2686_v19  ;;  %v2587_v52 = vcombine.low %v2378_v59, %v2468_v51  ;;  %v2588_v26 = vcombine.high %v2378_v59, %v2468_v51  ;;  %v5890_v59 = vld [vmem:[%s6280_s16 + $0x8] sm:$0xff]  }
 0x5a0   : > { %v5806_v20 = vpop.f32.mrf.mxu1  ;;  %v5811_v21 = vpop.f32.mrf.mxu0  ;;  %v2688_v50 = vcombine.high %v2662_v62, %v2670_v22  ;;  %v2704_v40 = vcombine.high %v2678_v63, %v2686_v19  ;;  %5820 = vmatpush3.bf16.msra.mxu0 %v5890_v59  ;;  %v2953_v59 = vld [vmem:[%s6298_s2 + $0x88] sm:$0xff] }
 0x5a1   : > { %v6653_v45 = vrot.slane %v2687_v24, %v6393_v12  ;;  %v6656_v29 = vrot.slane %v2703_v25, %v6393_v12  ;;  %v2595_v36 = vrot.slane %v2587_v52, %v6390_v5  ;;  %v2602_v17 = vrot.slane %v2588_v26, %v6390_v5  ;;  %5821 = vmatprep.subr.bf16.mxu0 %v6117_v23 }
 0x5a2   : > { %v2471_v27 = vpop.f32.mrf.mxu0  ;;  %v2513_v28 = vpop.f32.mrf.mxu1  ;;  %v2702_v3 = vrot.slane %v2688_v50, %v6393_v12  ;;  %v2718_v56 = vrot.slane %v2704_v40, %v6393_v12 }
 0x5a3   : > { %v2603_v53 = vcombine.low %v2423_v10, %v2513_v28  ;;  %v2604_v30 = vcombine.high %v2423_v10, %v2513_v28  ;;  %v2719_v35 = vcombine.low %v6653_v45, %v6656_v29  ;;  %v2720_v58 = vcombine.high %v6653_v45, %v6656_v29  ;;  %v5303_v45 = vld [vmem:[%s7089_s0] ss:$0 sm:$0xff] }
 0x5a4   : > { %v5812_v32 = vpop.f32.mrf.mxu0  ;;  %v5817_v33 = vpop.f32.mrf.mxu1  ;;  %v2721_v14 = vcombine.low %v2702_v3, %v2718_v56  ;;  %v2722_v19 = vcombine.high %v2702_v3, %v2718_v56  ;;  %v2944_v3 = vld [vmem:[%s6298_s2 + $0x40] sm:$0xff]  ;;  %v6127_v56 = vmov 0  }
 0x5a5   : > { %v2611_v54 = vrot.slane %v2603_v53, %v6390_v5  ;;  %v2618_v37 = vrot.slane %v2604_v30, %v6390_v5  ;;  %3247 = vmatprep.mubr.bf16.mxu1 %v6127_v56 }
 0x5a6   : > { %v2516_v18 = vpop.f32.mrf.mxu1 }
 0x5a7   : > { %v2619_v38 = vcombine.low %v2595_v36, %v2611_v54  ;;  %v2620_v39 = vcombine.high %v2595_v36, %v2611_v54  ;;  %v2635_v31 = vcombine.low %v2602_v17, %v2618_v37  ;;  %v2636_v34 = vcombine.high %v2602_v17, %v2618_v37 }
 0x5a8   : > { %v5818_v42 = vpop.f32.mrf.mxu1 }
 0x5a9   : > { %v2627_v43 = vrot.slane %v2619_v38, %v6393_v12  ;;  %v2634_v46 = vrot.slane %v2620_v39, %v6393_v12  ;;  %v2643_v47 = vrot.slane %v2635_v31, %v6393_v12  ;;  %v2650_v48 = vrot.slane %v2636_v34, %v6393_v12 }
 0x5ab   : > { %v2723_v41 = vcombine.low %v2627_v43, %v2634_v46  ;;  %v5301_v44 = vcombine.high %v2627_v43, %v2634_v46  ;;  %v2739_v55 = vcombine.low %v2643_v47, %v2650_v48  ;;  %v5302_v57 = vcombine.high %v2643_v47, %v2650_v48 }
 0x5ad   : > { %v2730_v60 = vrot.slane %v2723_v41, %v6390_v5  ;;  %v2738_v61 = vrot.slane %v5301_v44, %v6390_v5  ;;  %v2746_v0 = vrot.slane %v2739_v55, %v6390_v5  ;;  %v2754_v2 = vrot.slane %v5302_v57, %v6390_v5  ;;  %v5891_v5 = vld [vmem:[%s6280_s16] sm:$0xff]  }
 0x5ae   : > { %5822 = vmatpush3.bf16.msra.mxu0 %v5891_v5  ;;  %v2952_v55 = vld [vmem:[%s6298_s2 + $0x80] sm:$0xff]  ;;  %v2955_v5 = vld [vmem:[%s6298_s2 + $0x98] sm:$0xff] }
 0x5af   : > { %v2756_v4 = vcombine.high %v2730_v60, %v2738_v61  ;;  %v2772_v6 = vcombine.high %v2746_v0, %v2754_v2  ;;  %v2755_v7 = vcombine.low %v2730_v60, %v2738_v61  ;;  %v2771_v8 = vcombine.low %v2746_v0, %v2754_v2  ;;  %v2960_v57 = vld [vmem:[%s6298_s2 + $0xc0] sm:$0xff]  ;;  %v2961_v0 = vld [vmem:[%s6298_s2 + $0xc8] sm:$0xff] }
 0x5b0   : > { %v5325_v60 = vcombine.low %v2952_v55, %v2960_v57  ;;  %v5326_v61 = vcombine.high %v2952_v55, %v2960_v57  ;;  %v2936_v2 = vld [vmem:[%s6298_s2] sm:$0xff]  ;;  %v2958_v57 = vld [vmem:[%s6298_s2 + $0xb0] sm:$0xff] }
 0x5b1   : > { %v2770_v9 = vrot.slane %v2756_v4, %v6393_v12  ;;  %v2786_v10 = vrot.slane %v2772_v6, %v6393_v12  ;;  %v2763_v11 = vrot.slane %v2755_v7, %v6393_v12  ;;  %v2779_v13 = vrot.slane %v2771_v8, %v6393_v12  ;;  %v2937_v8 = vld [vmem:[%s6298_s2 + $0x8] sm:$0xff] }
 0x5b2   : > { %v5327_v4 = vcombine.low %v2953_v59, %v2961_v0  ;;  %v5328_v6 = vcombine.high %v2953_v59, %v2961_v0  ;;  %v5310_v7 = vcombine.high %v2936_v2, %v2944_v3  ;;  %3227 = vmatprep.subr.bf16.mxu1 %v5326_v61  ;;  %v2966_v59 = vld [vmem:[%s6298_s2 + $0xf0] sm:$0xff]  ;;  %v2967_v61 = vld [vmem:[%s6298_s2 + $0xf8] sm:$0xff] }
 0x5b3   : > { %v2789_v15 = vcombine.low %v2770_v9, %v2786_v10  ;;  %v2788_v16 = vcombine.high %v2763_v11, %v2779_v13  ;;  %v2787_v62 = vcombine.low %v2763_v11, %v2779_v13  ;;  %v2790_v23 = vcombine.high %v2770_v9, %v2786_v10  ;;  %v2945_v9 = vld [vmem:[%s6298_s2 + $0x48] sm:$0xff]  ;;  %v2954_v10 = vld [vmem:[%s6298_s2 + $0x90] sm:$0xff]  ;;  %3228 = vmatpush1.bf16.msra.mxu1 %v5325_v60  ;;  %v2959_v60 = vld [vmem:[%s6298_s2 + $0xb8] sm:$0xff] }
 0x5b4   : > { %v5312_v11 = vcombine.high %v2937_v8, %v2945_v9  ;;  %v2962_v13 = vld [vmem:[%s6298_s2 + $0xd0] sm:$0xff]  ;;  %3270 = vmatprep.subr.bf16.mxu0 %v5328_v6  ;;  %3229 = vmatprep.subr.bf16.mxu1 %v5310_v7 }
 0x5b5   : > { %v5876_v22 = vpack.i.bf16 %v2789_v15, %v2721_v14  ;;  %v5871_v63 = vpack.i.bf16 %v2788_v16, %v2720_v58  ;;  %v5881_v49 = vpack.i.bf16 %v2790_v23, %v2722_v19  ;;  %v2963_v14 = vld [vmem:[%s6298_s2 + $0xd8] sm:$0xff]  ;;  %v5309_v15 = vcombine.low %v2936_v2, %v2944_v3  ;;  %v2942_v6 = vld [vmem:[%s6298_s2 + $0x30] sm:$0xff] }
 0x5b6   : > { %v5329_v58 = vcombine.low %v2954_v10, %v2962_v13  ;;  %v5331_v16 = vcombine.low %v2955_v5, %v2963_v14  ;;  %v5338_v3 = vcombine.high %v2958_v57, %v2966_v59  ;;  %v2950_v7 = vld [vmem:[%s6298_s2 + $0x70] sm:$0xff] }
 0x5b7   : > { %5877 = vrot.lane.b32.xlu1 %v5876_v22, %s6124_s29  ;;  %5872 = vrot.lane.b32.xlu0 %v5871_v63, %s6125_s25  ;;  %v5330_v22 = vcombine.high %v2954_v10, %v2962_v13  ;;  %v5332_v63 = vcombine.high %v2955_v5, %v2963_v14  ;;  %v5337_v10 = vcombine.low %v2958_v57, %v2966_v59 }
 0x5b8   : > { %3230 = vmatpush1.bf16.msra.mxu1 %v5309_v15  ;;  %v5322_v13 = vcombine.high %v2942_v6, %v2950_v7  ;;  %v5321_v14 = vcombine.low %v2942_v6, %v2950_v7 }
 0x5b9   : > { %3313 = vmatprep.subr.bf16.mxu1 %v5330_v22  ;;  %v5895_v22 = vld [vmem:[%s6313_s18 + $0xb8] sm:$0xff]  }
 0x5bb   : > { %5882 = vrot.lane.b32.xlu1 %v5881_v49, %s6126_s21 }
 0x629   : > { %v5878_v12 = vpop.permute.xlu1 %5877  ;;  %v5873_v51 = vpop.permute.xlu0 %5872 }
 0x62a   : > { %v5875_v20 = vunpack.i.h.bf16 %v5873_v51  ;;  %v5874_v21 = vunpack.i.l.bf16 %v5873_v51  ;;  %v5880_v24 = vunpack.i.h.bf16 %v5878_v12  ;;  %v5879_v25 = vunpack.i.l.bf16 %v5878_v12 }
 0x62c   : > { %v2815_v52 = vsel %vm1693_vm6, %v2719_v35, %v5874_v21  ;;  %v2816_v26 = vsel %vm1693_vm6, %v2787_v62, %v5875_v20  ;;  %v5311_v62 = vcombine.low %v2937_v8, %v2945_v9  ;;  %v2943_v8 = vld [vmem:[%s6298_s2 + $0x38] sm:$0xff] }
 0x62d   : > { %v5883_v27 = vpop.permute.xlu1 %5882  ;;  %v2818_v30 = vsel %vm2817_vm8, %v2815_v52, %v5879_v25  ;;  %v2819_v32 = vsel %vm2817_vm8, %v2816_v26, %v5880_v24  ;;  %v5307_v25 = vld [vmem:[%s7090_s17] ss:$0 sm:$0xff]  ;;  %v2951_v9 = vld [vmem:[%s6298_s2 + $0x78] sm:$0xff] }
 0x62e   : > { %v5885_v28 = vunpack.i.h.bf16 %v5883_v27  ;;  %v5884_v53 = vunpack.i.l.bf16 %v5883_v27  ;;  %v5324_v5 = vcombine.high %v2943_v8, %v2951_v9  ;;  %v5323_v15 = vcombine.low %v2943_v8, %v2951_v9 }
 0x630   : > { %v2821_v33 = vsel %vm2820_vm9, %v2818_v30, %v5884_v53  ;;  %v2822_v36 = vsel %vm2820_vm9, %v2819_v32, %v5885_v28  ;;  %v5308_v28 = vld [vmem:[%s811_s6] ss:$0 sm:$0xff]  ;;  %v2938_v30 = vld [vmem:[%s6298_s2 + $0x10] sm:$0xff] }
 0x631   : > { %v2823_v17 = vpack.c.bf16 %v2822_v36, %v2821_v33  ;;  %v2946_v32 = vld [vmem:[%s6298_s2 + $0x50] sm:$0xff]  ;;  %v2939_v33 = vld [vmem:[%s6298_s2 + $0x18] sm:$0xff] }
 0x632   : > { %v2947_v36 = vld [vmem:[%s6298_s2 + $0x58] sm:$0xff] }
 0x633   : > { %5824 = vmatmul.mubr.msk.bf16.vlgmr.msra.gmra.mxu0 %vm859_vm4, %v2823_v17 }
 0x634   : > { %3290 = vmatprep.mubr.bf16.mxu0 %v6127_v56  ;;  %3271 = vmatpush1.bf16.msra.mxu0 %v5327_v4  ;;  %v5340_v4 = vcombine.high %v2959_v60, %v2967_v61 }
 0x635   : > { %3272 = vmatprep.subr.bf16.mxu0 %v5312_v11  ;;  %v5339_v11 = vcombine.low %v2959_v60, %v2967_v61 }
 0x638   : > { %3273 = vmatpush1.bf16.msra.mxu0 %v5311_v62  ;;  %v5894_v62 = vld [vmem:[%s6313_s18 + $0x38] sm:$0xff]  }
 0x639   : > { %3356 = vmatprep.subr.bf16.mxu0 %v5332_v63  ;;  %v5896_v63 = vld [vmem:[%s6313_s18 + $0x70] sm:$0xff]  }
 0x6f3   : > { %v2884_v29 = vpop.f32.mrf.mxu0 }
 0x6f4   : > { %v2885_v35 = vadd.f32 %v5303_v45, %v2884_v29 }
 0x6f5   : > { %v5825_v54 = vpop.f32.mrf.mxu0 }
 0x6f6   : > { %v2893_v37 = vsel %vm859_vm4, %v2885_v35, 0.0  ;;  %v5316_v54 = vcombine.high %v2939_v33, %v2947_v36 }
 0x6f7   : > { %2894 = vadd.xlane.f32.xlu1 %v2893_v37  ;;  %v2887_v18 = vpop.f32.mrf.mxu0  ;;  %v2956_v37 = vld [vmem:[%s6298_s2 + $0xa0] sm:$0xff] }
 0x6f8   : > { %v2888_v38 = vadd.f32 %v5303_v45, %v2887_v18  ;;  %v2964_v18 = vld [vmem:[%s6298_s2 + $0xe0] sm:$0xff] }
 0x6f9   : > { %v5826_v39 = vpop.f32.mrf.mxu0 }
 0x6fa   : > { %v2896_v31 = vsel %vm859_vm4, %v2888_v38, 0.0  ;;  %v2965_v39 = vld [vmem:[%s6298_s2 + $0xe8] sm:$0xff] }
 0x6fb   : > { %2897 = vadd.xlane.f32.xlu0 %v2896_v31  ;;  %v5313_v31 = vcombine.low %v2938_v30, %v2946_v32 }
 0x780   : > { %v2895_v34 = vpop.xlane.xlu1 %2894 }
 0x781   : > { %v2899_v42 = vmul.f32 0.03125, %v2895_v34  ;;  %v5315_v34 = vcombine.low %v2939_v33, %v2947_v36  ;;  %v5914_v33 = vld [vmem:[%s6313_s18 + $0x10] sm:$0xff]  }
 0x782   : > { %v5915_v36 = vld [vmem:[%s6313_s18 + $0x90] sm:$0xff]  }
 0x783   : > { %v2901_v43 = vsub.f32 %v2885_v35, %v2899_v42  ;;  %v5314_v35 = vcombine.high %v2938_v30, %v2946_v32  ;;  %v5334_v42 = vcombine.high %v2956_v37, %v2964_v18  ;;  %v5912_v30 = vld [vmem:[%s6313_s18 + $0x50] sm:$0xff]  }
 0x784   : > { %v2898_v46 = vpop.xlane.xlu0 %2897  ;;  %v5913_v32 = vld [vmem:[%s6313_s18 + $0xd0] sm:$0xff]  }
 0x785   : > { %v2900_v47 = vmul.f32 0.03125, %v2898_v46  ;;  %v2903_v48 = vmul.f32 %v2901_v43, %v2901_v43  ;;  %v2940_v46 = vld [vmem:[%s6298_s2 + $0x20] sm:$0xff] }
 0x787   : > { %v2902_v50 = vsub.f32 %v2888_v38, %v2900_v47  ;;  %v2905_v40 = vsel %vm859_vm4, %v2903_v48, 0.0  ;;  %v2957_v38 = vld [vmem:[%s6298_s2 + $0xa8] sm:$0xff]  ;;  %v2948_v47 = vld [vmem:[%s6298_s2 + $0x60] sm:$0xff] }
 0x788   : > { %2906 = vadd.xlane.f32.xlu0 %v2905_v40  ;;  %v2941_v48 = vld [vmem:[%s6298_s2 + $0x28] sm:$0xff]  ;;  %v5333_v40 = vcombine.low %v2956_v37, %v2964_v18  ;;  %v5317_v0 = vcombine.low %v2940_v46, %v2948_v47  ;;  %v5921_v37 = vld [vmem:[%s6313_s18 + $0xc0] sm:$0xff]  }
 0x789   : > { %v2904_v41 = vmul.f32 %v2902_v50, %v2902_v50  ;;  %v5922_v18 = vld [vmem:[%s6313_s18] sm:$0xff]  }
 0x78b   : > { %v2908_v44 = vsel %vm859_vm4, %v2904_v41, 0.0  ;;  %v5335_v41 = vcombine.low %v2957_v38, %v2965_v39 }
 0x78c   : > { %2909 = vadd.xlane.f32.xlu0 %v2908_v44  ;;  %v5318_v44 = vcombine.high %v2940_v46, %v2948_v47  ;;  %v2982_v46 = vsub.s32 2, %v6387_v1  ;;  %v6806_v47 = vld [vmem:[%s6303_s8] sm:$0xff] }
 0x811   : > { %v2907_v23 = vpop.xlane.xlu0 %2906 }
 0x812   : > { %v2911_v19 = vmul.f32 0.032258064, %v2907_v23  ;;  %v5897_v23 = vld [vmem:[%s6313_s18 + $0xf0] sm:$0xff]  }
 0x814   : > { %6056 = vrsqrt.f32 %v2911_v19  ;;  %v5899_v19 = vld [vmem:[%s6313_s18 + $0xb0] sm:$0xff]  }
 0x815   : > { %v2910_v49 = vpop.xlane.xlu0 %2909 }
 0x816   : > { %v2912_v12 = vmul.f32 0.032258064, %v2910_v49  ;;  %v5900_v49 = vld [vmem:[%s6313_s18 + $0x68] sm:$0xff]  }
 0x818   : > { %6058 = vrsqrt.f32 %v2912_v12  ;;  %v5901_v12 = vld [vmem:[%s6313_s18 + $0xe8] sm:$0xff]  }
 0x821   : > { %v6057_v51 = vpop.eup %6056 }
 0x822   : > { %v2915_v20 = vmul.f32 %v6057_v51, %v2901_v43  ;;  %v5336_v43 = vcombine.high %v2957_v38, %v2965_v39  ;;  %v5902_v51 = vld [vmem:[%s6313_s18 + $0x28] sm:$0xff]   ;;  %v5923_v38 = vld [vmem:[%s6313_s18 + $0x80] sm:$0xff]   ;;  %v5924_v39 = vld [vmem:[%s6313_s18 + $0x178] sm:$0xff]  }
 0x824   : > { %v2917_v21 = vadd.f32 1e-06, %v2915_v20  ;;  %v5903_v20 = vld [vmem:[%s6313_s18 + $0xa8] sm:$0xff]  }
 0x825   : > { %v6059_v24 = vpop.eup %6058 }
 0x826   : > { %v2916_v52 = vmul.f32 %v6059_v24, %v2902_v50  ;;  %v2925_v26 = vmul.f32 %v5307_v25, %v2917_v21  ;;  %v2949_v50 = vld [vmem:[%s6298_s2 + $0x68] sm:$0xff]  ;;  %v5904_v21 = vld [vmem:[%s6313_s18 + $0x60] sm:$0xff]   ;;  %s7091_s2 = sld [smem:[#allocation17_spill]] (!%p5478_p6) }
 0x827   : > { %v5320_v55 = vcombine.high %v2941_v48, %v2949_v50  ;;  %v5319_v2 = vcombine.low %v2941_v48, %v2949_v50  ;;  %v5905_v24 = vld [vmem:[%s6313_s18 + $0xe0] sm:$0xff]  }
 0x828   : > { %v2918_v27 = vadd.f32 1e-06, %v2916_v52  ;;  %v2933_v17 = vadd.f32 %v5308_v28, %v2925_v26  ;;  %v5907_v52 = vld [vmem:[%s6313_s18 + $0xa0] sm:$0xff]   ;;  %v5908_v26 = vld [vmem:[%s6313_s18 + $0x58] sm:$0xff]  }
 0x82a   : > { %v2926_v53 = vmul.f32 %v5307_v25, %v2918_v27  ;;  %v5906_v25 = vld [vmem:[%s6313_s18 + $0x20] sm:$0xff]   ;;  %v5909_v27 = vld [vmem:[%s6313_s18 + $0xd8] sm:$0xff]  }
 0x82c   : > { %v2934_v45 = vadd.f32 %v5308_v28, %v2926_v53  ;;  %v5910_v28 = vld [vmem:[%s6313_s18 + $0x18] sm:$0xff]  }
 0x82d   : > { %v5911_v53 = vld [vmem:[%s6313_s18 + $0x98] sm:$0xff]  }
 0x82e   : > { %v6727_v29 = vpack.c.bf16 %v2934_v45, %v2933_v17  ;;  %v5916_v17 = vld [vmem:[%s6313_s18 + $0x48] sm:$0xff]  }
 0x82f   : > { %v5917_v45 = vld [vmem:[%s6313_s18 + $0xc8] sm:$0xff]  }
 0x830   : > { %5341 = vmatmul.mubr.msk.bf16.vlgmr.msra.gmra.mxu1 %vm859_vm4, %v6727_v29  ;;  %5342 = vmatmul.mubr.msk.bf16.vlgmr.msra.gmra.mxu0 %vm859_vm4, %v6727_v29 }
 0x831   : > { %3314 = vmatpush1.bf16.msra.mxu1 %v5329_v58  ;;  %3357 = vmatpush1.bf16.msra.mxu0 %v5331_v16  ;;  %v5892_v58 = vld [vmem:[%s6313_s18 + $0x78] sm:$0xff]  }
 0x832   : > { %3315 = vmatprep.subr.bf16.mxu1 %v5314_v35  ;;  %3358 = vmatprep.subr.bf16.mxu0 %v5316_v54  ;;  %v5893_v16 = vld [vmem:[%s6313_s18 + $0xf8] sm:$0xff]   ;;  %v5919_v35 = vld [vmem:[%s6313_s18 + $0x88] sm:$0xff]   ;;  %v5920_v54 = vld [vmem:[%s6313_s18 + $0x40] sm:$0xff]  }
 0x833   : > { %3333 = vmatprep.mubr.bf16.mxu1 %v6127_v56  ;;  %3376 = vmatprep.mubr.bf16.mxu0 %v6127_v56 }
 0x835   : > { %3316 = vmatpush1.bf16.msra.mxu1 %v5313_v31  ;;  %3359 = vmatpush1.bf16.msra.mxu0 %v5315_v34  ;;  %v5925_v31 = vld [vmem:[%s6313_s18 + $0x1f8] sm:$0xff]   ;;  %v2978_v34 = vsub.s32 1, %v6387_v1 }
 0x836   : > { %3399 = vmatprep.subr.bf16.mxu1 %v5334_v42  ;;  %3442 = vmatprep.subr.bf16.mxu0 %v5336_v43  ;;  %v2986_v42 = vsub.s32 3, %v6387_v1  ;;  %v2974_v43 = vsub.s32 0, %v6387_v1 }
 0x838   : > { %5343 = vmatmul.mubr.msk.bf16.vlgmr.msra.gmra.mxu1 %vm859_vm4, %v6727_v29  ;;  %5344 = vmatmul.mubr.msk.bf16.vlgmr.msra.gmra.mxu0 %vm859_vm4, %v6727_v29 }
 0x839   : > { %3400 = vmatpush1.bf16.msra.mxu1 %v5333_v40  ;;  %3443 = vmatpush1.bf16.msra.mxu0 %v5335_v41  ;;  %v2979_v40 = vrot.slane %v6806_v47, %v2978_v34  ;;  %v2987_v41 = vrot.slane %v6806_v47, %v2986_v42 }
 0x83a   : > { %3401 = vmatprep.subr.bf16.mxu1 %v5318_v44  ;;  %3444 = vmatprep.subr.bf16.mxu0 %v5320_v55  ;;  %v2975_v44 = vrot.slane %v6806_v47, %v2974_v43  ;;  %v2983_v55 = vrot.slane %v6806_v47, %v2982_v46 }
 0x83b   : > { %3419 = vmatprep.mubr.bf16.mxu1 %v6127_v56  ;;  %3462 = vmatprep.mubr.bf16.mxu0 %v6127_v56 }
 0x83d   : > { %3402 = vmatpush1.bf16.msra.mxu1 %v5317_v0  ;;  %3445 = vmatpush1.bf16.msra.mxu0 %v5319_v2  ;;  %v2994_v0 = vsub.s32 5, %v6387_v1  ;;  %v3002_v2 = vsub.s32 7, %v6387_v1 }
 0x83e   : > { %3485 = vmatprep.subr.bf16.mxu1 %v5338_v3  ;;  %3528 = vmatprep.subr.bf16.mxu0 %v5340_v4 }
 0x840   : > { %5345 = vmatmul.mubr.msk.bf16.vlgmr.msra.gmra.mxu1 %vm859_vm4, %v6727_v29  ;;  %5346 = vmatmul.mubr.msk.bf16.vlgmr.msra.gmra.mxu0 %vm859_vm4, %v6727_v29 }
 0x841   : > { %3486 = vmatpush1.bf16.msra.mxu1 %v5337_v10  ;;  %3529 = vmatpush1.bf16.msra.mxu0 %v5339_v11 }
 0x842   : > { %3487 = vmatprep.subr.bf16.mxu1 %v5322_v13  ;;  %3530 = vmatprep.subr.bf16.mxu0 %v5324_v5 }
 0x843   : > { %3505 = vmatprep.mubr.bf16.mxu1 %v6127_v56  ;;  %3548 = vmatprep.mubr.bf16.mxu0 %v6127_v56  ;;  %v5898_v56 = vld [vmem:[%s6313_s18 + $0x30] sm:$0xff]  }
 0x845   : > { %3488 = vmatpush1.bf16.msra.mxu1 %v5321_v14  ;;  %3531 = vmatpush1.bf16.msra.mxu0 %v5323_v15 }
 0x846   : > { %5531 = vmatprep.subr.bf16.mxu1 %v5892_v58  ;;  %5553 = vmatprep.subr.bf16.mxu0 %v5893_v16 }
 0x848   : > { %5347 = vmatmul.mubr.msk.bf16.vlgmr.msra.gmra.mxu1 %vm859_vm4, %v6727_v29  ;;  %5348 = vmatmul.mubr.msk.bf16.vlgmr.msra.gmra.mxu0 %vm859_vm4, %v6727_v29  ;;  %v5918_v29 = vld [vmem:[%s6313_s18 + $0x8] sm:$0xff]  }
 0x849   : > { %5532 = vmatpush3.bf16.msra.mxu1 %v5894_v62  ;;  %5554 = vmatpush3.bf16.msra.mxu0 %v5895_v22  ;;  %v2995_v62 = vrot.slane %v6806_v47, %v2994_v0  ;;  %v3003_v22 = vrot.slane %v6806_v47, %v3002_v2 }
 0x84a   : > { %5533 = vmatprep.subr.bf16.mxu1 %v5896_v63  ;;  %5555 = vmatprep.subr.bf16.mxu0 %v5897_v23 }
 0x84d   : > { %5534 = vmatpush3.bf16.msra.mxu1 %v5898_v56  ;;  %5556 = vmatpush3.bf16.msra.mxu0 %v5899_v19 }
 0x84e   : > { %5535 = vmatprep.subr.bf16.mxu1 %v5900_v49  ;;  %5557 = vmatprep.subr.bf16.mxu0 %v5901_v12 }
 0x851   : > { %5536 = vmatpush3.bf16.msra.mxu1 %v5902_v51  ;;  %5558 = vmatpush3.bf16.msra.mxu0 %v5903_v20 }
 0x852   : > { %5537 = vmatprep.subr.bf16.mxu1 %v5904_v21  ;;  %5559 = vmatprep.subr.bf16.mxu0 %v5905_v24 }
 0x855   : > { %5538 = vmatpush3.bf16.msra.mxu1 %v5906_v25  ;;  %5560 = vmatpush3.bf16.msra.mxu0 %v5907_v52  ;;  %v5926_v25 = vld [vmem:[%s6313_s18 + $0x138] sm:$0xff]  }
 0x856   : > { %5539 = vmatprep.subr.bf16.mxu1 %v5908_v26  ;;  %5561 = vmatprep.subr.bf16.mxu0 %v5909_v27  ;;  %v5927_v52 = vld [vmem:[%s6313_s18 + $0x1b8] sm:$0xff]  }
 0x859   : > { %5540 = vmatpush3.bf16.msra.mxu1 %v5910_v28  ;;  %5562 = vmatpush3.bf16.msra.mxu0 %v5911_v53 }
 0x85a   : > { %5541 = vmatprep.subr.bf16.mxu1 %v5912_v30  ;;  %5563 = vmatprep.subr.bf16.mxu0 %v5913_v32  ;;  %v5928_v30 = vld [vmem:[%s6313_s18 + $0x170] sm:$0xff]  }
 0x85b   : > { %v5929_v32 = vld [vmem:[%s6313_s18 + $0x1f0] sm:$0xff]  }
 0x85d   : > { %5542 = vmatpush3.bf16.msra.mxu1 %v5914_v33  ;;  %5564 = vmatpush3.bf16.msra.mxu0 %v5915_v36 }
 0x85e   : > { %5543 = vmatprep.subr.bf16.mxu1 %v5916_v17  ;;  %5565 = vmatprep.subr.bf16.mxu0 %v5917_v45 }
 0x861   : > { %5544 = vmatpush3.bf16.msra.mxu1 %v5918_v29  ;;  %5566 = vmatpush3.bf16.msra.mxu0 %v5919_v35 }
 0x862   : > { %5545 = vmatprep.subr.bf16.mxu1 %v5920_v54  ;;  %5567 = vmatprep.subr.bf16.mxu0 %v5921_v37  ;;  %v5930_v54 = vld [vmem:[%s6313_s18 + $0x130] sm:$0xff]  }
 0x863   : > { %v5931_v37 = vld [vmem:[%s6313_s18 + $0x1b0] sm:$0xff]  }
 0x865   : > { %5546 = vmatpush3.bf16.msra.mxu1 %v5922_v18  ;;  %5568 = vmatpush3.bf16.msra.mxu0 %v5923_v38  ;;  %v5932_v18 = vld [vmem:[%s6313_s18 + $0x168] sm:$0xff]  }
 0x866   : > { %5575 = vmatprep.subr.bf16.mxu1 %v5924_v39  ;;  %5597 = vmatprep.subr.bf16.mxu0 %v5925_v31 }
 0x8f0   : > { %v3249_v48 = vpop.f32.mrf.mxu1  ;;  %v3292_v50 = vpop.f32.mrf.mxu0 }
 0x8f1   : > { %v3250_v8 = vadd.f32 %v3249_v48, %v2975_v44  ;;  %v3293_v9 = vadd.f32 %v3292_v50, %v2983_v55  ;;  %v5933_v50 = vld [vmem:[%s6313_s18 + $0x1e8] sm:$0xff]  }
 0x8f2   : > { %v3251_v57 = vpop.f32.mrf.mxu1  ;;  %v3294_v59 = vpop.f32.mrf.mxu0 }
 0x8f3   : > { %v3252_v3 = vadd.f32 %v3251_v57, %v2979_v40  ;;  %v3295_v4 = vadd.f32 %v3294_v59, %v2987_v41  ;;  %v3559_v49 = vmax.f32 %v3250_v8, 0.0  ;;  %v3561_v12 = vmax.f32 %v3293_v9, 0.0  ;;  %v5936_v57 = vld [vmem:[%s6313_s18 + $0x160] sm:$0xff]   ;;  %v5942_v9 = vld [vmem:[%s6313_s18 + $0x118] sm:$0xff]  }
 0x8f4   : > { %v3253_v60 = vpop.f32.mrf.mxu1  ;;  %v3296_v61 = vpop.f32.mrf.mxu0  ;;  %v5937_v59 = vld [vmem:[%s6313_s18 + $0x1e0] sm:$0xff]  }
 0x8f5   : > { %v3254_v6 = vadd.f32 %v3253_v60, %v2975_v44  ;;  %v3297_v7 = vadd.f32 %v3296_v61, %v2983_v55  ;;  %v3560_v63 = vmax.f32 %v3252_v3, 0.0  ;;  %v3562_v23 = vmax.f32 %v3295_v4, 0.0  ;;  %v5934_v44 = vld [vmem:[%s6313_s18 + $0x128] sm:$0xff]   ;;  %v5938_v61 = vld [vmem:[%s6313_s18 + $0x120] sm:$0xff]  }
 0x8f6   : > { %v3255_v10 = vpop.f32.mrf.mxu1  ;;  %v3298_v11 = vpop.f32.mrf.mxu0  ;;  %v5935_v55 = vld [vmem:[%s6313_s18 + $0x1a8] sm:$0xff]   ;;  %v5939_v4 = vld [vmem:[%s6313_s18 + $0x1a0] sm:$0xff]  }
 0x8f7   : > { %v3256_v13 = vadd.f32 %v3255_v10, %v2979_v40  ;;  %v3299_v5 = vadd.f32 %v3298_v11, %v2987_v41  ;;  %v3575_v14 = vmax.f32 %v3254_v6, 0.0  ;;  %v3577_v15 = vmax.f32 %v3297_v7, 0.0  ;;  %v5940_v6 = vld [vmem:[%s6313_s18 + $0x158] sm:$0xff]  }
 0x8f8   : > { %v6822_v58 = vpop.f32.mrf.mxu1  ;;  %v6824_v16 = vpop.f32.mrf.mxu0  ;;  %v5941_v7 = vld [vmem:[%s6313_s18 + $0x1d8] sm:$0xff]  }
 0x8f9   : > { %v3576_v56 = vmax.f32 %v3256_v13, 0.0  ;;  %v3578_v19 = vmax.f32 %v3299_v5, 0.0  ;;  %v3591_v26 = vpack.c.bf16 %v3575_v14, %v3559_v49  ;;  %v3593_v27 = vpack.c.bf16 %v3577_v15, %v3561_v12  ;;  %v5943_v11 = vld [vmem:[%s6313_s18 + $0x198] sm:$0xff]   ;;  %v5944_v13 = vld [vmem:[%s6313_s18 + $0x150] sm:$0xff]  }
 0x8fa   : > { %v3337_v51 = vpop.f32.mrf.mxu1  ;;  %v3380_v20 = vpop.f32.mrf.mxu0  ;;  %v5945_v5 = vld [vmem:[%s6313_s18 + $0x1d0] sm:$0xff]   ;;  %v2990_v14 = vsub.s32 4, %v6387_v1  ;;  %v2998_v15 = vsub.s32 6, %v6387_v1  ;;  %v6018_v1 = vld [vmem:[%s6313_s18 + $0x300] sm:$0xff]  }
 0x8fb   : > { %v3592_v21 = vpack.c.bf16 %v3576_v56, %v3560_v63  ;;  %v3594_v24 = vpack.c.bf16 %v3578_v19, %v3562_v23  ;;  %v3338_v33 = vadd.f32 %v3337_v51, %v2995_v62  ;;  %v3381_v36 = vadd.f32 %v3380_v20, %v3003_v22  ;;  %v5947_v23 = vld [vmem:[%s6313_s18 + $0x190] sm:$0xff]   ;;  %v5948_v56 = vld [vmem:[%s6313_s18 + $0x148] sm:$0xff]  }
 0x8fc   : > { %v6834_v28 = vpop.f32.mrf.mxu1  ;;  %v6836_v53 = vpop.f32.mrf.mxu0  ;;  %v5949_v19 = vld [vmem:[%s6313_s18 + $0x1c8] sm:$0xff]   ;;  %v2991_v49 = vrot.slane %v6806_v47, %v2990_v14  ;;  %v2999_v12 = vrot.slane %v6806_v47, %v2998_v15 }
 0x8fd   : > { %4670 = vmatprep.mubr.bf16.mxu1 %v3592_v21  ;;  %4711 = vmatprep.mubr.bf16.mxu0 %v3594_v24  ;;  %v3564_v38 = vmax.f32 %v3338_v33, 0.0  ;;  %v3566_v39 = vmax.f32 %v3381_v36, 0.0  ;;  %v6877_v51 = vld [vmem:[%s6303_s8 + $0x8] sm:$0xff] }
 0x8fe   : > { %v3341_v17 = vpop.f32.mrf.mxu1  ;;  %v3384_v45 = vpop.f32.mrf.mxu0  ;;  %4671 = vmatmul.mubr.bf16.vlgmr.msra.gmra.mxu1 %v3591_v26  ;;  %4712 = vmatmul.mubr.bf16.vlgmr.msra.gmra.mxu0 %v3593_v27  ;;  %v5950_v21 = vld [vmem:[%s6313_s18 + $0x108] sm:$0xff]   ;;  %v3340_v24 = vadd.f32 %v6834_v28, %v2991_v49  ;;  %v5952_v27 = vld [vmem:[%s6313_s18 + $0x140] sm:$0xff]   ;;  %v3383_v47 = vadd.f32 %v6836_v53, %v2999_v12 }
 0x8ff   : > { %v3342_v29 = vadd.f32 %v3341_v17, %v2995_v62  ;;  %v3385_v35 = vadd.f32 %v3384_v45, %v3003_v22  ;;  %5576 = vmatpush3.bf16.msra.mxu1 %v5926_v25  ;;  %5598 = vmatpush3.bf16.msra.mxu0 %v5927_v52  ;;  %v5946_v22 = vld [vmem:[%s6313_s18 + $0x110] sm:$0xff]   ;;  %v3011_v25 = vrot.slane %v6877_v51, %v2978_v34  ;;  %v5951_v26 = vld [vmem:[%s6313_s18 + $0x188] sm:$0xff]   ;;  %v5953_v28 = vld [vmem:[%s6313_s18 + $0x1c0] sm:$0xff]  }
 0x900   : > { %5577 = vmatprep.subr.bf16.mxu1 %v5928_v30  ;;  %5599 = vmatprep.subr.bf16.mxu0 %v5929_v32  ;;  %v6848_v60 = vpop.f32.mrf.mxu1  ;;  %v6851_v3 = vpop.f32.mrf.mxu0  ;;  %v3019_v30 = vrot.slane %v6877_v51, %v2986_v42  ;;  %v3336_v32 = vadd.f32 %v6822_v58, %v2991_v49  ;;  %v3379_v34 = vadd.f32 %v6824_v16, %v2999_v12  ;;  %v5954_v17 = vld [vmem:[%s6313_s18 + $0x100] sm:$0xff]   ;;  %v3579_v45 = vmax.f32 %v3340_v24, 0.0  ;;  %v5974_v12 = vld [vmem:[%s6313_s18 + $0x218] sm:$0xff]   ;;  %v5976_v24 = vld [vmem:[%s6313_s18 + $0x250] sm:$0xff]  }
 0x901   : > { %v3580_v31 = vmax.f32 %v3342_v29, 0.0  ;;  %v3582_v48 = vmax.f32 %v3385_v35, 0.0  ;;  %v5955_v53 = vld [vmem:[%s6313_s18 + $0x180] sm:$0xff]   ;;  %v5956_v35 = vld [vmem:[%s6313_s18 + $0x278] sm:$0xff]   ;;  %v3581_v42 = vmax.f32 %v3383_v47, 0.0  ;;  %v5979_v47 = vld [vmem:[%s6313_s18 + $0x290] sm:$0xff]  }
 0x902   : > { %v3423_v8 = vpop.f32.mrf.mxu1  ;;  %v3466_v10 = vpop.f32.mrf.mxu0  ;;  %v3563_v58 = vmax.f32 %v3336_v32, 0.0  ;;  %v3565_v16 = vmax.f32 %v3379_v34, 0.0  ;;  %v3007_v32 = vrot.slane %v6877_v51, %v2974_v43  ;;  %v5984_v43 = vld [vmem:[%s6313_s18 + $0x240] sm:$0xff]  }
 0x903   : > { %v3596_v40 = vpack.c.bf16 %v3580_v31, %v3564_v38  ;;  %v3598_v41 = vpack.c.bf16 %v3582_v48, %v3566_v39  ;;  %5578 = vmatpush3.bf16.msra.mxu1 %v5930_v54  ;;  %5600 = vmatpush3.bf16.msra.mxu0 %v5931_v37  ;;  %v3424_v29 = vadd.f32 %v3423_v8, %v3011_v25  ;;  %v5957_v37 = vld [vmem:[%s6313_s18 + $0x2f8] sm:$0xff]   ;;  %v5966_v8 = vld [vmem:[%s6313_s18 + $0x228] sm:$0xff]  }
 0x904   : > { %5579 = vmatprep.subr.bf16.mxu1 %v5932_v18  ;;  %5601 = vmatprep.subr.bf16.mxu0 %v5933_v50  ;;  %v6862_v62 = vpop.f32.mrf.mxu1  ;;  %v6865_v63 = vpop.f32.mrf.mxu0  ;;  %v3467_v54 = vadd.f32 %v3466_v10, %v3019_v30  ;;  %v5958_v39 = vld [vmem:[%s6313_s18 + $0x238] sm:$0xff]   ;;  %v3595_v31 = vpack.c.bf16 %v3579_v45, %v3563_v58  ;;  %v5968_v10 = vld [vmem:[%s6313_s18 + $0x260] sm:$0xff]   ;;  %v3027_v45 = vrot.slane %v6877_v51, %v2994_v0 }
 0x905   : > { %4752 = vmatprep.mubr.bf16.mxu1 %v3596_v40  ;;  %4793 = vmatprep.mubr.bf16.mxu0 %v3598_v41  ;;  %v3568_v48 = vmax.f32 %v3424_v29, 0.0  ;;  %v5959_v50 = vld [vmem:[%s6313_s18 + $0x2b8] sm:$0xff]   ;;  %v3597_v40 = vpack.c.bf16 %v3581_v42, %v3565_v16  ;;  %v3422_v42 = vadd.f32 %v6848_v60, %v3007_v32  ;;  %v5986_v58 = vld [vmem:[%s6313_s18 + $0x200] sm:$0xff]  }
 0x906   : > { %v3427_v20 = vpop.f32.mrf.mxu1  ;;  %v3470_v52 = vpop.f32.mrf.mxu0  ;;  %v3570_v41 = vmax.f32 %v3467_v54, 0.0 }
 0x907   : > { %5580 = vmatpush3.bf16.msra.mxu1 %v5934_v44  ;;  %5602 = vmatpush3.bf16.msra.mxu0 %v5935_v55  ;;  %v3428_v33 = vadd.f32 %v3427_v20, %v3011_v25  ;;  %v3471_v36 = vadd.f32 %v3470_v52, %v3019_v30  ;;  %v5960_v44 = vld [vmem:[%s6313_s18 + $0x270] sm:$0xff]   ;;  %v5980_v30 = vld [vmem:[%s6313_s18 + $0x248] sm:$0xff]   ;;  %v3567_v60 = vmax.f32 %v3422_v42, 0.0 }
 0x908   : > { %5581 = vmatprep.subr.bf16.mxu1 %v5936_v57  ;;  %5603 = vmatprep.subr.bf16.mxu0 %v5937_v59  ;;  %v5961_v57 = vld [vmem:[%s6313_s18 + $0x2f0] sm:$0xff]  }
 0x909   : > { %v3584_v18 = vmax.f32 %v3428_v33, 0.0  ;;  %v3586_v38 = vmax.f32 %v3471_v36, 0.0  ;;  %v5977_v25 = vld [vmem:[%s6313_s18 + $0x2d0] sm:$0xff]   ;;  %v3015_v33 = vrot.slane %v6877_v51, %v2982_v46  ;;  %v5982_v36 = vld [vmem:[%s6313_s18 + $0x208] sm:$0xff]   ;;  %v3035_v46 = vrot.slane %v6877_v51, %v3002_v2 }
 0x90b   : > { %5582 = vmatpush3.bf16.msra.mxu1 %v5938_v61  ;;  %5604 = vmatpush3.bf16.msra.mxu0 %v5939_v4  ;;  %v3600_v55 = vpack.c.bf16 %v3584_v18, %v3568_v48  ;;  %v3602_v59 = vpack.c.bf16 %v3586_v38, %v3570_v41  ;;  %v5962_v61 = vld [vmem:[%s6313_s18 + $0x230] sm:$0xff]   ;;  %v3465_v0 = vadd.f32 %v6851_v3, %v3015_v33  ;;  %v5988_v38 = vld [vmem:[%s6313_s18 + $0x378] sm:$0xff]  }
 0x90c   : > { %5583 = vmatprep.subr.bf16.mxu1 %v5940_v6  ;;  %5605 = vmatprep.subr.bf16.mxu0 %v5941_v7  ;;  %v5963_v4 = vld [vmem:[%s6313_s18 + $0x2b0] sm:$0xff]   ;;  %v5964_v6 = vld [vmem:[%s6313_s18 + $0x268] sm:$0xff]  }
 0x90d   : > { %v5965_v7 = vld [vmem:[%s6313_s18 + $0x2e8] sm:$0xff]   ;;  %v3569_v3 = vmax.f32 %v3465_v0, 0.0 }
 0x90f   : > { %5584 = vmatpush3.bf16.msra.mxu1 %v5942_v9  ;;  %5606 = vmatpush3.bf16.msra.mxu0 %v5943_v11  ;;  %v5967_v9 = vld [vmem:[%s6313_s18 + $0x2a8] sm:$0xff]   ;;  %v5969_v11 = vld [vmem:[%s6313_s18 + $0x2e0] sm:$0xff]  }
 0x910   : > { %5585 = vmatprep.subr.bf16.mxu1 %v5944_v13  ;;  %5607 = vmatprep.subr.bf16.mxu0 %v5945_v5  ;;  %v6909_v13 = vpop.f32.mrf.mxu1  ;;  %v5970_v5 = vld [vmem:[%s6313_s18 + $0x220] sm:$0xff]  }
 0x912   : > { %v3509_v49 = vpop.f32.mrf.mxu1 }
 0x913   : > { %5586 = vmatpush3.bf16.msra.mxu1 %v5946_v22  ;;  %5608 = vmatpush3.bf16.msra.mxu0 %v5947_v23  ;;  %v6912_v22 = vpop.f32.mrf.mxu0  ;;  %v5971_v23 = vld [vmem:[%s6313_s18 + $0x2a0] sm:$0xff]   ;;  %v3510_v16 = vadd.f32 %v3509_v49, %v3027_v45 }
 0x914   : > { %5587 = vmatprep.subr.bf16.mxu1 %v5948_v56  ;;  %5609 = vmatprep.subr.bf16.mxu0 %v5949_v19  ;;  %v5972_v56 = vld [vmem:[%s6313_s18 + $0x258] sm:$0xff]   ;;  %v6921_v52 = vpop.f32.mrf.mxu1  ;;  %v6002_v49 = vld [vmem:[%s6313_s18 + $0x320] sm:$0xff]  }
 0x915   : > { %v5973_v19 = vld [vmem:[%s6313_s18 + $0x2d8] sm:$0xff]   ;;  %v3552_v20 = vpop.f32.mrf.mxu0 }
 0x916   : > { %v3513_v34 = vpop.f32.mrf.mxu1 }
 0x917   : > { %5588 = vmatpush3.bf16.msra.mxu1 %v5950_v21  ;;  %5610 = vmatpush3.bf16.msra.mxu0 %v5951_v26  ;;  %v5975_v21 = vld [vmem:[%s6313_s18 + $0x298] sm:$0xff]   ;;  %v5978_v26 = vld [vmem:[%s6313_s18 + $0x210] sm:$0xff]   ;;  %v3514_v54 = vadd.f32 %v3513_v34, %v3027_v45  ;;  %v3023_v34 = vrot.slane %v6877_v51, %v2990_v14 }
 0x918   : > { %5589 = vmatprep.subr.bf16.mxu1 %v5952_v27  ;;  %5611 = vmatprep.subr.bf16.mxu0 %v5953_v28  ;;  %v6924_v27 = vpop.f32.mrf.mxu0  ;;  %v5981_v28 = vld [vmem:[%s6313_s18 + $0x2c8] sm:$0xff]  }
 0x919   : > { %v3588_v48 = vmax.f32 %v3514_v54, 0.0  ;;  %v3512_v45 = vadd.f32 %v6921_v52, %v3023_v34 }
 0x91a   : > { %v3556_v29 = vpop.f32.mrf.mxu0 }
 0x91b   : > { %5590 = vmatpush3.bf16.msra.mxu1 %v5954_v17  ;;  %5612 = vmatpush3.bf16.msra.mxu0 %v5955_v53  ;;  %v3426_v17 = vadd.f32 %v6862_v62, %v3007_v32  ;;  %v5983_v53 = vld [vmem:[%s6313_s18 + $0x288] sm:$0xff]   ;;  %v5985_v62 = vld [vmem:[%s6313_s18 + $0x2c0] sm:$0xff]  }
 0x91c   : > { %5619 = vmatprep.subr.bf16.mxu1 %v5956_v35  ;;  %5641 = vmatprep.subr.bf16.mxu0 %v5957_v37  ;;  %v3469_v35 = vadd.f32 %v6865_v63, %v3015_v33  ;;  %v3557_v37 = vadd.f32 %v3556_v29, %v3035_v46  ;;  %v5987_v63 = vld [vmem:[%s6313_s18 + $0x280] sm:$0xff]   ;;  %v6012_v32 = vld [vmem:[%s6313_s18 + $0x348] sm:$0xff]  }
 0x91d   : > { %v3583_v18 = vmax.f32 %v3426_v17, 0.0  ;;  %v6013_v33 = vld [vmem:[%s6313_s18 + $0x3c8] sm:$0xff]  }
 0x91e   : > { %4753 = vmatmul.mubr.bf16.vlgmr.msra.gmra.mxu1 %v3595_v31  ;;  %4794 = vmatmul.mubr.bf16.vlgmr.msra.gmra.mxu0 %v3597_v40  ;;  %v3585_v2 = vmax.f32 %v3469_v35, 0.0  ;;  %v5989_v31 = vld [vmem:[%s6313_s18 + $0x3f8] sm:$0xff]   ;;  %v6014_v17 = vld [vmem:[%s6313_s18 + $0x308] sm:$0xff]   ;;  %v6017_v35 = vld [vmem:[%s6313_s18 + $0x3c0] sm:$0xff]  }
 0x91f   : > { %5620 = vmatpush3.bf16.msra.mxu1 %v5958_v39  ;;  %4834 = vmatprep.mubr.bf16.mxu1 %v3600_v55  ;;  %v3553_v39 = vadd.f32 %v3552_v20, %v3035_v46  ;;  %v5990_v40 = vld [vmem:[%s6313_s18 + $0x338] sm:$0xff]   ;;  %v3599_v41 = vpack.c.bf16 %v3583_v18, %v3567_v60  ;;  %v6015_v29 = vld [vmem:[%s6313_s18 + $0x388] sm:$0xff]   ;;  %v3508_v46 = vadd.f32 %v6909_v13, %v3023_v34 }
 0x920   : > { %5642 = vmatpush3.bf16.msra.mxu0 %v5959_v50  ;;  %4875 = vmatprep.mubr.bf16.mxu0 %v3602_v59  ;;  %v3590_v50 = vmax.f32 %v3557_v37, 0.0  ;;  %v5991_v55 = vld [vmem:[%s6313_s18 + $0x3b8] sm:$0xff]  }
 0x921   : > { %5621 = vmatprep.subr.bf16.mxu1 %v5960_v44  ;;  %5643 = vmatprep.subr.bf16.mxu0 %v5961_v57  ;;  %v3572_v44 = vmax.f32 %v3510_v16, 0.0  ;;  %v3601_v57 = vpack.c.bf16 %v3585_v2, %v3569_v3  ;;  %v3574_v59 = vmax.f32 %v3553_v39, 0.0  ;;  %v6004_v20 = vld [vmem:[%s6313_s18 + $0x358] sm:$0xff]   ;;  %v3571_v52 = vmax.f32 %v3508_v46, 0.0 }
 0x923   : > { %5622 = vmatpush3.bf16.msra.mxu1 %v5962_v61  ;;  %v5992_v61 = vld [vmem:[%s6313_s18 + $0x370] sm:$0xff]  }
 0x924   : > { %5644 = vmatpush3.bf16.msra.mxu0 %v5963_v4  ;;  %5623 = vmatprep.subr.bf16.mxu1 %v5964_v6  ;;  %v3604_v4 = vpack.c.bf16 %v3588_v48, %v3572_v44  ;;  %v5993_v6 = vld [vmem:[%s6313_s18 + $0x3f0] sm:$0xff]  }
 0x925   : > { %5645 = vmatprep.subr.bf16.mxu0 %v5965_v7  ;;  %v3606_v7 = vpack.c.bf16 %v3590_v50, %v3574_v59 }
 0x927   : > { %5624 = vmatpush3.bf16.msra.mxu1 %v5966_v8  ;;  %v5994_v8 = vld [vmem:[%s6313_s18 + $0x330] sm:$0xff]  }
 0x928   : > { %5646 = vmatpush3.bf16.msra.mxu0 %v5967_v9  ;;  %5625 = vmatprep.subr.bf16.mxu1 %v5968_v10  ;;  %v5995_v9 = vld [vmem:[%s6313_s18 + $0x3b0] sm:$0xff]   ;;  %v5996_v10 = vld [vmem:[%s6313_s18 + $0x368] sm:$0xff]  }
 0x929   : > { %5647 = vmatprep.subr.bf16.mxu0 %v5969_v11  ;;  %v5997_v11 = vld [vmem:[%s6313_s18 + $0x3e8] sm:$0xff]  }
 0x92b   : > { %5626 = vmatpush3.bf16.msra.mxu1 %v5970_v5  ;;  %v5998_v5 = vld [vmem:[%s6313_s18 + $0x328] sm:$0xff]  }
 0x92c   : > { %5648 = vmatpush3.bf16.msra.mxu0 %v5971_v23  ;;  %5627 = vmatprep.subr.bf16.mxu1 %v5972_v56  ;;  %v5999_v23 = vld [vmem:[%s6313_s18 + $0x3a8] sm:$0xff]   ;;  %v6000_v56 = vld [vmem:[%s6313_s18 + $0x360] sm:$0xff]  }
 0x92d   : > { %5649 = vmatprep.subr.bf16.mxu0 %v5973_v19  ;;  %v6001_v19 = vld [vmem:[%s6313_s18 + $0x3e0] sm:$0xff]  }
 0x92f   : > { %5628 = vmatpush3.bf16.msra.mxu1 %v5974_v12  ;;  %v6003_v12 = vld [vmem:[%s6313_s18 + $0x3a0] sm:$0xff]  }
 0x930   : > { %5650 = vmatpush3.bf16.msra.mxu0 %v5975_v21  ;;  %5629 = vmatprep.subr.bf16.mxu1 %v5976_v24  ;;  %v6005_v21 = vld [vmem:[%s6313_s18 + $0x3d8] sm:$0xff]  }
 0x931   : > { %5651 = vmatprep.subr.bf16.mxu0 %v5977_v25  ;;  %v6006_v24 = vld [vmem:[%s6313_s18 + $0x318] sm:$0xff]  }
 0x932   : > { %v6007_v25 = vld [vmem:[%s6313_s18 + $0x398] sm:$0xff]  }
 0x933   : > { %5630 = vmatpush3.bf16.msra.mxu1 %v5978_v26  ;;  %v6008_v26 = vld [vmem:[%s6313_s18 + $0x350] sm:$0xff]  }
 0x934   : > { %5652 = vmatpush3.bf16.msra.mxu0 %v5979_v47  ;;  %5631 = vmatprep.subr.bf16.mxu1 %v5980_v30  ;;  %v6009_v47 = vld [vmem:[%s6313_s18 + $0x3d0] sm:$0xff]  }
 0x935   : > { %5653 = vmatprep.subr.bf16.mxu0 %v5981_v28  ;;  %v6010_v30 = vld [vmem:[%s6313_s18 + $0x310] sm:$0xff]  }
 0x936   : > { %v6011_v28 = vld [vmem:[%s6313_s18 + $0x390] sm:$0xff]  }
 0x937   : > { %5632 = vmatpush3.bf16.msra.mxu1 %v5982_v36  ;;  %v3031_v36 = vrot.slane %v6877_v51, %v2998_v15  ;;  %v3587_v15 = vmax.f32 %v3512_v45, 0.0  ;;  %v6019_v51 = vld [vmem:[%s6313_s18 + $0x380] sm:$0xff]  }
 0x938   : > { %5654 = vmatpush3.bf16.msra.mxu0 %v5983_v53  ;;  %5633 = vmatprep.subr.bf16.mxu1 %v5984_v43  ;;  %v6016_v53 = vld [vmem:[%s6313_s18 + $0x340] sm:$0xff]  }
 0x939   : > { %5655 = vmatprep.subr.bf16.mxu0 %v5985_v62  ;;  %v3555_v43 = vadd.f32 %v6924_v27, %v3031_v36  ;;  %v3551_v14 = vadd.f32 %v6912_v22, %v3031_v36  ;;  %v3603_v54 = vpack.c.bf16 %v3587_v15, %v3571_v52 }
 0x93b   : > { %5634 = vmatpush3.bf16.msra.mxu1 %v5986_v58  ;;  %v3589_v62 = vmax.f32 %v3555_v43, 0.0  ;;  %v3573_v42 = vmax.f32 %v3551_v14, 0.0 }
 0x93c   : > { %5656 = vmatpush3.bf16.msra.mxu0 %v5987_v63  ;;  %5663 = vmatprep.subr.bf16.mxu1 %v5988_v38 }
 0x93d   : > { %5685 = vmatprep.subr.bf16.mxu0 %v5989_v31  ;;  %v3605_v27 = vpack.c.bf16 %v3589_v62, %v3573_v42 }
 0x93e   : > { %4835 = vmatmul.mubr.bf16.vlgmr.msra.gmra.mxu1 %v3599_v41 }
 0x93f   : > { %4876 = vmatmul.mubr.bf16.vlgmr.msra.gmra.mxu0 %v3601_v57  ;;  %5664 = vmatpush3.bf16.msra.mxu1 %v5990_v40  ;;  %v5349_v40 = vld [vmem:[%s828_s1] ss:$0 sm:$0xff] }
 0x940   : > { %4916 = vmatprep.mubr.bf16.mxu1 %v3604_v4  ;;  %5686 = vmatpush3.bf16.msra.mxu0 %v5991_v55 }
 0x941   : > { %4957 = vmatprep.mubr.bf16.mxu0 %v3606_v7  ;;  %5665 = vmatprep.subr.bf16.mxu1 %v5992_v61 }
 0x942   : > { %5687 = vmatprep.subr.bf16.mxu0 %v5993_v6 }
 0x943   : > { %5666 = vmatpush3.bf16.msra.mxu1 %v5994_v8 }
 0x944   : > { %5688 = vmatpush3.bf16.msra.mxu0 %v5995_v9  ;;  %5667 = vmatprep.subr.bf16.mxu1 %v5996_v10 }
 0x945   : > { %5689 = vmatprep.subr.bf16.mxu0 %v5997_v11 }
 0x947   : > { %5668 = vmatpush3.bf16.msra.mxu1 %v5998_v5 }
 0x948   : > { %5690 = vmatpush3.bf16.msra.mxu0 %v5999_v23  ;;  %5669 = vmatprep.subr.bf16.mxu1 %v6000_v56 }
 0x949   : > { %5691 = vmatprep.subr.bf16.mxu0 %v6001_v19 }
 0x94b   : > { %5670 = vmatpush3.bf16.msra.mxu1 %v6002_v49 }
 0x94c   : > { %5692 = vmatpush3.bf16.msra.mxu0 %v6003_v12  ;;  %5671 = vmatprep.subr.bf16.mxu1 %v6004_v20 }
 0x94d   : > { %5693 = vmatprep.subr.bf16.mxu0 %v6005_v21 }
 0x94f   : > { %5672 = vmatpush3.bf16.msra.mxu1 %v6006_v24 }
 0x950   : > { %5694 = vmatpush3.bf16.msra.mxu0 %v6007_v25  ;;  %5673 = vmatprep.subr.bf16.mxu1 %v6008_v26 }
 0x951   : > { %5695 = vmatprep.subr.bf16.mxu0 %v6009_v47 }
 0x953   : > { %5674 = vmatpush3.bf16.msra.mxu1 %v6010_v30 }
 0x954   : > { %5696 = vmatpush3.bf16.msra.mxu0 %v6011_v28  ;;  %5675 = vmatprep.subr.bf16.mxu1 %v6012_v32 }
 0x955   : > { %5697 = vmatprep.subr.bf16.mxu0 %v6013_v33 }
 0x957   : > { %5676 = vmatpush3.bf16.msra.mxu1 %v6014_v17 }
 0x958   : > { %5698 = vmatpush3.bf16.msra.mxu0 %v6015_v29  ;;  %5677 = vmatprep.subr.bf16.mxu1 %v6016_v53 }
 0x959   : > { %5699 = vmatprep.subr.bf16.mxu0 %v6017_v35 }
 0x95b   : > { %5678 = vmatpush3.bf16.msra.mxu1 %v6018_v1 }
 0x95c   : > { %5700 = vmatpush3.bf16.msra.mxu0 %v6019_v51 }
 0x95e   : > { %4917 = vmatmul.mubr.bf16.vlgmr.msra.gmra.mxu1 %v3603_v54 }
 0x95f   : > { %4958 = vmatmul.mubr.bf16.vlgmr.msra.gmra.mxu0 %v3605_v27 }
 0x9be   : > { %v5547_v0 = vpop.f32.mrf.mxu1  ;;  %v5569_v13 = vpop.f32.mrf.mxu0 }
 0x9c0   : > { %v5548_v22 = vpop.f32.mrf.mxu1  ;;  %v5570_v37 = vpop.f32.mrf.mxu0 }
 0x9c1   : > { %v5549_v50 = vadd.f32 %v5548_v22, %v5547_v0  ;;  %v5571_v4 = vadd.f32 %v5570_v37, %v5569_v13 }
 0x9c2   : > { %v5550_v58 = vpop.f32.mrf.mxu1  ;;  %v5572_v18 = vpop.f32.mrf.mxu0 }
 0x9c3   : > { %v4673_v55 = vadd.f32 %v5549_v50, %v5349_v40 }
 0x9c4   : > { %v5551_v16 = vpop.f32.mrf.mxu1  ;;  %v5573_v38 = vpop.f32.mrf.mxu0 }
 0x9c5   : > { %v5552_v57 = vadd.f32 %v5551_v16, %v5550_v58  ;;  %v4714_v7 = vadd.f32 %v5571_v4, %v4673_v55  ;;  %v5574_v11 = vadd.f32 %v5573_v38, %v5572_v18 }
 0x9c7   : > { %v4676_v8 = vadd.f32 %v5552_v57, %v5349_v40 }
 0x9c9   : > { %v4717_v56 = vadd.f32 %v5574_v11, %v4676_v8 }
 0x9de   : > { %v5591_v63 = vpop.f32.mrf.mxu1  ;;  %v5613_v2 = vpop.f32.mrf.mxu0 }
 0x9e0   : > { %v5592_v39 = vpop.f32.mrf.mxu1  ;;  %v5614_v31 = vpop.f32.mrf.mxu0 }
 0x9e1   : > { %v5593_v6 = vadd.f32 %v5592_v39, %v5591_v63  ;;  %v5615_v19 = vadd.f32 %v5614_v31, %v5613_v2 }
 0x9e2   : > { %v5594_v60 = vpop.f32.mrf.mxu1  ;;  %v5616_v48 = vpop.f32.mrf.mxu0 }
 0x9e3   : > { %v4755_v5 = vadd.f32 %v5593_v6, %v4714_v7 }
 0x9e4   : > { %v5595_v3 = vpop.f32.mrf.mxu1  ;;  %v5617_v44 = vpop.f32.mrf.mxu0 }
 0x9e5   : > { %v5596_v23 = vadd.f32 %v5595_v3, %v5594_v60  ;;  %v4796_v21 = vadd.f32 %v5615_v19, %v4755_v5  ;;  %v5618_v25 = vadd.f32 %v5617_v44, %v5616_v48 }
 0x9e7   : > { %v4758_v24 = vadd.f32 %v5596_v23, %v4717_v56 }
 0x9e9   : > { %v4799_v32 = vadd.f32 %v5618_v25, %v4758_v24 }
 0x9fe   : > { %v5635_v41 = vpop.f32.mrf.mxu1 }
 0x9ff   : > { %v5657_v59 = vpop.f32.mrf.mxu0 }
 0xa00   : > { %v5636_v61 = vpop.f32.mrf.mxu1 }
 0xa01   : > { %v5658_v9 = vpop.f32.mrf.mxu0  ;;  %v5637_v49 = vadd.f32 %v5636_v61, %v5635_v41 }
 0xa02   : > { %v5638_v10 = vpop.f32.mrf.mxu1  ;;  %v5659_v33 = vadd.f32 %v5658_v9, %v5657_v59 }
 0xa03   : > { %v5660_v12 = vpop.f32.mrf.mxu0  ;;  %v4837_v26 = vadd.f32 %v5637_v49, %v4796_v21 }
 0xa04   : > { %v5639_v20 = vpop.f32.mrf.mxu1 }
 0xa05   : > { %v5640_v47 = vadd.f32 %v5639_v20, %v5638_v10  ;;  %v5661_v30 = vpop.f32.mrf.mxu0  ;;  %v4878_v17 = vadd.f32 %v5659_v33, %v4837_v26 }
 0xa06   : > { %v5662_v35 = vadd.f32 %v5661_v30, %v5660_v12 }
 0xa07   : > { %v4840_v45 = vadd.f32 %v5640_v47, %v4799_v32 }
 0xa09   : > { %v4881_v51 = vadd.f32 %v5662_v35, %v4840_v45 }
 0xa1e   : > { %v5679_v28 = vpop.f32.mrf.mxu1 }
 0xa1f   : > { %v5701_v34 = vpop.f32.mrf.mxu0 }
 0xa20   : > { %v5680_v36 = vpop.f32.mrf.mxu1 }
 0xa21   : > { %v5681_v29 = vadd.f32 %v5680_v36, %v5679_v28  ;;  %v5702_v53 = vpop.f32.mrf.mxu0 }
 0xa22   : > { %v5682_v43 = vpop.f32.mrf.mxu1  ;;  %v5703_v14 = vadd.f32 %v5702_v53, %v5701_v34 }
 0xa23   : > { %v4919_v46 = vadd.f32 %v5681_v29, %v4878_v17  ;;  %v5704_v1 = vpop.f32.mrf.mxu0 }
 0xa24   : > { %v5683_v15 = vpop.f32.mrf.mxu1 }
 0xa25   : > { %v4960_v62 = vadd.f32 %v5703_v14, %v4919_v46  ;;  %v5684_v52 = vadd.f32 %v5683_v15, %v5682_v43  ;;  %v5705_v42 = vpop.f32.mrf.mxu0 }
 0xa26   : > { %v5706_v27 = vadd.f32 %v5705_v42, %v5704_v1 }
 0xa27   : > { %4966 = vst.msk [vmem:[#allocation2] sm:$0xff] %vm859_vm4, %v4960_v62  ;;  %v4922_v54 = vadd.f32 %v5684_v52, %v4881_v51  ;;  %4971 = sbr.rel (%p5478_p6) target bundleno = 2917 (0xb65), region = 100 }
 0xa29   : > { %v4963_v0 = vadd.f32 %v5706_v27, %v4922_v54 }
 0xa2b   : > { %4967 = vst.msk [vmem:[#allocation2 + $0x8] sm:$0xff] %vm859_vm4, %v4963_v0 }
 0xa2c   : > { %v4974_v13 = vsel %vm859_vm4, %v4960_v62, 0.0  ;;  %v4977_v22 = vsel %vm859_vm4, %v4963_v0, 0.0  ;;  %v5479_v55 = vld [vmem:[%s7091_s2] ss:$0 sm:$0xff] }
 0xa2d   : > { %4975 = vadd.xlane.f32.xlu0 %v4974_v13  ;;  %v5480_v61 = vld [vmem:[%s7092_s20] ss:$0 sm:$0xff] }
 0xa31   : > { %4978 = vadd.xlane.f32.xlu0 %v4977_v22 }
 0xab6   : > { %v4976_v37 = vpop.xlane.xlu0 %4975 }
 0xab7   : > { %v4980_v58 = vmul.f32 0.03125, %v4976_v37 }
 0xab9   : > { %v4982_v18 = vsub.f32 %v4960_v62, %v4980_v58 }
 0xaba   : > { %v4979_v16 = vpop.xlane.xlu0 %4978 }
 0xabb   : > { %v4981_v63 = vmul.f32 0.03125, %v4979_v16  ;;  %v4984_v38 = vmul.f32 %v4982_v18, %v4982_v18 }
 0xabd   : > { %v4983_v2 = vsub.f32 %v4963_v0, %v4981_v63  ;;  %v4986_v39 = vsel %vm859_vm4, %v4984_v38, 0.0 }
 0xabe   : > { %4987 = vadd.xlane.f32.xlu1 %v4986_v39 }
 0xabf   : > { %v4985_v31 = vmul.f32 %v4983_v2, %v4983_v2 }
 0xac1   : > { %v4989_v60 = vsel %vm859_vm4, %v4985_v31, 0.0 }
 0xac2   : > { %4990 = vadd.xlane.f32.xlu1 %v4989_v60 }
 0xb47   : > { %v4988_v48 = vpop.xlane.xlu1 %4987 }
 0xb48   : > { %v4992_v3 = vmul.f32 0.032258064, %v4988_v48 }
 0xb4a   : > { %6060 = vrsqrt.f32 %v4992_v3 }
 0xb4b   : > { %v4991_v50 = vpop.xlane.xlu1 %4990 }
 0xb4c   : > { %v4993_v40 = vmul.f32 0.032258064, %v4991_v50 }
 0xb4e   : > { %6062 = vrsqrt.f32 %v4993_v40 }
 0xb57   : > { %v6061_v41 = vpop.eup %6060 }
 0xb58   : > { %v4996_v44 = vmul.f32 %v6061_v41, %v4982_v18 }
 0xb5a   : > { %v4998_v57 = vadd.f32 1e-06, %v4996_v44 }
 0xb5b   : > { %v6063_v59 = vpop.eup %6062 }
 0xb5c   : > { %v5006_v4 = vmul.f32 %v5479_v55, %v4998_v57  ;;  %v4997_v6 = vmul.f32 %v6063_v59, %v4983_v2 }
 0xb5e   : > { %v5014_v7 = vadd.f32 %v5480_v61, %v5006_v4  ;;  %v4999_v8 = vadd.f32 1e-06, %v4997_v6 }
 0xb60   : > { %5016 = vst.msk [vmem:[#allocation4] sm:$0xff] %vm859_vm4, %v5014_v7  ;;  %v5007_v9 = vmul.f32 %v5479_v55, %v4999_v8 }
 0xb62   : > { %v5015_v10 = vadd.f32 %v5480_v61, %v5007_v9 }
 0xb64   : > { %5017 = vst.msk [vmem:[#allocation4 + $0x8] sm:$0xff] %vm859_vm4, %v5015_v10 }
 0xb65 PF: > { %s7093_s5 = sld [smem:[#allocation8_spill]]  ;;  %s6128_s16 = smov [#allocation4]  }
 0xb66   : > { %s5027_s24 = sshll.u32 %s6128_s16, 4  ;;  %s5028_s24 = int_to_ptr.vmem [resolvable:$true] %s5027_s24 }
 0xb67   : > { %s6064_s0 = scalar_lea.vmem %s5028_s24, 256  ;;  %p6071_p11 = scmp.lt.s32.totalorder %s5028_s24, %s5028_s24 }
 0xb68   : > { %p6065_p8 = scmp.ne.s32.totalorder %s5028_s24, %s6064_s0  ;;  %p6072_p12 = scmp.lt.s32.totalorder %s6064_s0, %s6064_s0 }
 0xb6a   : > { %p6073_p13 = por %p6072_p12, %p6071_p11 }
 0xb6b   : > { %s7094_s29 = sadd.s32 4294967295, %s7093_s5  }
 0xb6c   : > { %p7015_p7 = scmp.eq.s32.totalorder %s7094_s29, 1 }
 0xb6e   : > { %p6066_p9 = pnand %p6065_p8, %p7015_p7 }
 0xb70   : > { %p6067_p10 = pneg %p6066_p9 }
 0xb72   : > { %p6074_p0 = pnand %p6073_p13, %p6067_p10 }
 0xb74   : > { %6077 = shalt.err (!%p6074_p0)
}
 0xb75   : > { %s6129_s4 = smov 128   ;;  %s7096_s28 = sld [smem:[#allocation19_spill]] }
 0xb7b   : > { %5828 = dma.vmem_to_hbm [thread:$0]  (%p7015_p7), %s5028_s24, 256, %s7096_s28, [#allocation5], %s6129_s4, %s6129_s4, %s6125_s25  }
 0xb7c   : > { %6101 = dma.done.wait (%p7015_p7), [#allocation5], 256  }
 0xb7d   : > { %6103 = vsyncadd (%p7015_p7), [#allocation5], 4294967040 }
 0xb7e PF: > { %s7097_s26 = sld [smem:[#allocation8_spill]] }
 0xb7f   : > { %s7098_s27 = sld [smem:[#allocation7_spill]] }
 0xb80   : > { %s7099_s28 = sld [smem:[#allocation9_spill]] }
 0xb84   : > { %s29_s29 = sadd.s32 1, %s7097_s26  }
 0xb85   : > { %p26_p1 = scmp.ge.s32.totalorder %s29_s29, 4  }
 0xb87   :  { %28 = sbr.rel (!%p26_p1) target bundleno = 13 (0xd), region = 173 }
 0xb8c   :  { %5043 = vsyncpa [#allocation5], 1 }
 0xb8d   :  { %5045 = vsyncpa [#allocation5 + $0x1], 1 }

</bundles_post_ra>
